<compile_context>
chip_gen: v7x
topology: tpu7x:2x2x1
jax: 0.10.0
libtpu: 0.0.40
codegen_flags: <defaults>
</compile_context>

<pallas_src>
import jax
import jax.numpy as jnp
import numpy as np
from jax import lax
from jax.experimental import pallas as pl
from jax.experimental.pallas import tpu as pltpu

EPS = 1e-5


# --------------------------- kernel bodies ---------------------------

def _conv3x3_accumulate(xb, w_ref, pad_ref):
    """xb: (h, w, cp) bf16 conv input (un-padded).  Stages it into the 1-px
    zero-padded bf16 scratch `pad_ref` and returns the 3x3 'SAME' conv as a
    (h*w, cp) f32 accumulator built from 9 accumulating K=cp MXU matmuls."""
    h, w, cp = xb.shape
    hp, wp = h + 2, w + 2

    # Zero the 1-px halo every grid step (the scratch is per-TensorCore and the
    # "parallel" grid axis may be sharded across cores, so a program_id()==0
    # one-shot zero would NOT be megacore-safe); interior written exactly once.
    zrow = jnp.zeros((1, wp, cp), xb.dtype)
    zcol = jnp.zeros((h, 1, cp), xb.dtype)
    pad_ref[0:1, :, :] = zrow
    pad_ref[hp - 1:hp, :, :] = zrow
    pad_ref[1:h + 1, 0:1, :] = zcol
    pad_ref[1:h + 1, wp - 1:wp, :] = zcol
    pad_ref[1:h + 1, 1:w + 1, :] = xb

    xp = pad_ref[...]                                  # (hp, wp, cp) bf16
    acc = jnp.zeros((h * w, cp), jnp.float32)
    for k in range(9):                                 # 9 accumulating K=cp matmuls
        dy, dx = divmod(k, 3)
        lhs = xp[dy:dy + h, dx:dx + w, :].reshape(h * w, cp)
        acc = acc + jnp.dot(lhs, w_ref[k], preferred_element_type=jnp.float32)
    return acc


def _store_conv_and_stats(acc, out_ref, stats_ref):
    """Write conv output tile and this tile's partial BN statistics (f32)."""
    _, h, w, cp = out_ref.shape
    out_ref[...] = acc.reshape(1, h, w, cp).astype(out_ref.dtype)
    stats_ref[:, 0:1, :] = jnp.sum(acc, axis=0, keepdims=True).reshape(1, 1, cp)
    stats_ref[:, 1:2, :] = jnp.sum(acc * acc, axis=0, keepdims=True).reshape(1, 1, cp)


def conv1_kernel(x_ref, w_ref, out_ref, stats_ref, pad_ref):
    # cast to bf16 exactly once per tile
    xb = x_ref[0].astype(jnp.bfloat16)                 # (h, w, cp)
    acc = _conv3x3_accumulate(xb, w_ref, pad_ref)
    _store_conv_and_stats(acc, out_ref, stats_ref)


def bn_relu_conv2_kernel(y_ref, s_ref, t_ref, w_ref, out_ref, stats_ref, pad_ref):
    _, h, w, cp = y_ref.shape
    s = s_ref[...].reshape(1, 1, cp)                   # bn1 folded scale
    t = t_ref[...].reshape(1, 1, cp)                   # bn1 folded shift
    a = jnp.maximum(y_ref[0].astype(jnp.float32) * s + t, 0.0)   # bn1 + relu
    acc = _conv3x3_accumulate(a.astype(jnp.bfloat16), w_ref, pad_ref)
    _store_conv_and_stats(acc, out_ref, stats_ref)


def bn_add_relu_kernel(z_ref, x_ref, s_ref, t_ref, out_ref):
    cp = z_ref.shape[-1]
    s = s_ref[...].reshape(1, 1, 1, cp)
    t = t_ref[...].reshape(1, 1, 1, cp)
    out_ref[...] = jnp.maximum(z_ref[...] * s + t + x_ref[...], 0.0).astype(out_ref.dtype)


# ----------------------------- wrapper -----------------------------

def _bn_scale_shift(partials, gamma_p, beta_p, count):
    """Reduce per-image partial sums to global batch statistics and fold them
    into a per-channel scale/shift (training-mode BN: biased variance)."""
    s = jnp.sum(partials[:, 0, :], axis=0)
    sq = jnp.sum(partials[:, 1, :], axis=0)
    mean = s / count
    # Single-pass E[x^2]-E[x]^2 in f32 (clamped); adequate here but can drift
    # from a two-pass result for very large counts / magnitudes.
    var = jnp.maximum(sq / count - mean * mean, 0.0)
    inv = gamma_p * lax.rsqrt(var + EPS)
    return inv.reshape(1, -1), (beta_p - mean * inv).reshape(1, -1)


def _vmem_limit(est_bytes):
    # Footprint-derived scoped-VMEM request, capped below v7x's 64 MiB
    # physical VMEM per TensorCore to leave headroom for double buffers.
    return int(min(max(2 * est_bytes, 32 * 1024 * 1024), 48 * 1024 * 1024))


def basic_block_forward(x_nchw, w1, g1, b1, w2, g2, b2):
    """x_nchw: (N, C, H, W) f32; conv weights HWIO (3,3,C,C); BN affine (C,).
    BasicBlock defaults: stride=1, downsample=None, quantize=False, training BN."""
    x = jnp.transpose(x_nchw, (0, 2, 3, 1)).astype(jnp.float32)    # -> NHWC
    n, h, w, c = x.shape
    assert w1.shape == (3, 3, c, c) and w2.shape == (3, 3, c, c), \
        "identity add requires inplanes == planes (no downsample)"
    # TODO(synk): stride>1 / downsample / quantize branches not implemented
    # (module defaults: stride=1, downsample=None, quantize=False).
    # TODO(synk): training-mode BatchNorm running_mean/running_var momentum
    # updates are not emitted (forward output only).

    cp = ((c + 127) // 128) * 128       # lane-dense channel count
    pc = cp - c
    # Channel pad only (padded channels stay exactly 0 through the whole block
    # because gamma pads with 0, and are sliced off at the end).  Note: for
    # small real C this writes zero lanes back to HBM; acceptable here.
    xp = jnp.pad(x, ((0, 0), (0, 0), (0, 0), (0, pc)))             # (n,h,w,cp) f32

    def prep_w(wk):                     # HWIO -> (9, cp, cp) bf16, k = dy*3+dx
        wk = jnp.pad(wk, ((0, 0), (0, 0), (0, pc), (0, pc)))
        return wk.reshape(9, cp, cp).astype(jnp.bfloat16)

    def prep_v(v):                      # (C,) -> (cp,) f32, zero padded
        return jnp.pad(v, (0, pc)).astype(jnp.float32)

    w1m, w2m = prep_w(w1), prep_w(w2)
    g1p, b1p, g2p, b2p = prep_v(g1), prep_v(b1), prep_v(g2), prep_v(b2)

    rows = n * h * w
    img_spec = pl.BlockSpec((1, h, w, cp), lambda i: (i, 0, 0, 0))
    wgt_spec = pl.BlockSpec((9, cp, cp), lambda i: (0, 0, 0))      # resident
    vec_spec = pl.BlockSpec((1, cp), lambda i: (0, 0))             # resident
    st_spec = pl.BlockSpec((1, 2, cp), lambda i: (i, 0, 0))

    blk_f32 = h * w * cp * 4
    est = (2 * blk_f32                          # input image block (double-buffered)
           + 2 * blk_f32                        # output image block (double-buffered)
           + 2 * blk_f32                        # f32 accumulator + slice temporaries
           + 9 * cp * cp * 2                    # resident bf16 weights
           + (h + 2) * (w + 2) * cp * 2)        # bf16 padded staging scratch
    conv_params = pltpu.CompilerParams(
        dimension_semantics=("parallel",),      # shard batch across v7x's 2 TCs
        vmem_limit_bytes=_vmem_limit(est))
    scratch = [pltpu.VMEM((h + 2, w + 2, cp), jnp.bfloat16)]

    # ---- pass 1: conv1 + per-image partial BN1 statistics ----
    y1, st1 = pl.pallas_call(
        conv1_kernel,
        grid=(n,),
        out_shape=(jax.ShapeDtypeStruct((n, h, w, cp), jnp.bfloat16),
                   jax.ShapeDtypeStruct((n, 2, cp), jnp.float32)),
        in_specs=[img_spec, wgt_spec],
        out_specs=(img_spec, st_spec),
        scratch_shapes=scratch,
        compiler_params=conv_params,
    )(xp, w1m)
    s1, t1 = _bn_scale_shift(st1, g1p, b1p, rows)      # tiny JAX reduction

    # ---- pass 2: bn1 + relu + conv2 + per-image partial BN2 statistics ----
    y2, st2 = pl.pallas_call(
        bn_relu_conv2_kernel,
        grid=(n,),
        out_shape=(jax.ShapeDtypeStruct((n, h, w, cp), jnp.float32),
                   jax.ShapeDtypeStruct((n, 2, cp), jnp.float32)),
        in_specs=[img_spec, vec_spec, vec_spec, wgt_spec],
        out_specs=(img_spec, st_spec),
        scratch_shapes=scratch,
        compiler_params=conv_params,
    )(y1, s1, t1, w2m)
    s2, t2 = _bn_scale_shift(st2, g2p, b2p, rows)

    # ---- pass 3: bn2 + identity add + relu (tile-aligned residual) ----
    out = pl.pallas_call(
        bn_add_relu_kernel,
        grid=(n,),
        out_shape=jax.ShapeDtypeStruct((n, h, w, cp), jnp.float32),
        in_specs=[img_spec, img_spec, vec_spec, vec_spec],
        out_specs=img_spec,
        compiler_params=pltpu.CompilerParams(dimension_semantics=("parallel",)),
    )(y2, xp, s2, t2)

    out = out[..., :c]
    return jnp.transpose(out, (0, 3, 1, 2))                        # -> NCHW


# ----------------------------- reference (pure JAX) -----------------------------
def _ref_forward(x_nchw, w1, g1, b1, w2, g2, b2):
    x = jnp.transpose(x_nchw, (0, 2, 3, 1))
    dn = ('NHWC', 'HWIO', 'NHWC')

    def conv(a, wt):
        return lax.conv_general_dilated(a, wt, (1, 1), 'SAME', dimension_numbers=dn)

    def bn(a, g, bt):
        m = jnp.mean(a, axis=(0, 1, 2), keepdims=True)
        v = jnp.mean((a - m) ** 2, axis=(0, 1, 2), keepdims=True)
        return (a - m) * lax.rsqrt(v + EPS) * g.reshape(1, 1, 1, -1) + bt.reshape(1, 1, 1, -1)

    y = jnp.maximum(bn(conv(x, w1), g1, b1), 0.0)
    o = bn(conv(y, w2), g2, b2) + x
    o = jnp.maximum(o, 0.0)
    return jnp.transpose(o, (0, 3, 1, 2))


if __name__ == "__main__":
    key = jax.random.PRNGKey(0)
    k_x, k_w1, k_w2, k_g1, k_b1, k_g2, k_b2 = jax.random.split(key, 7)

    N, C, H, W = 2, 8, 16, 16            # inplanes == planes == 8, stride=1
    x = jax.random.normal(k_x, (N, C, H, W), jnp.float32)

    # conv3x3 weights (no bias), HWIO
    w1 = 0.1 * jax.random.normal(k_w1, (3, 3, C, C), jnp.float32)
    w2 = 0.1 * jax.random.normal(k_w2, (3, 3, C, C), jnp.float32)
    # BatchNorm affine params (PyTorch default gamma=1, beta=0; perturb slightly)
    g1 = 1.0 + 0.1 * jax.random.normal(k_g1, (C,), jnp.float32)
    b1 = 0.1 * jax.random.normal(k_b1, (C,), jnp.float32)
    g2 = 1.0 + 0.1 * jax.random.normal(k_g2, (C,), jnp.float32)
    b2 = 0.1 * jax.random.normal(k_b2, (C,), jnp.float32)

    out = jax.block_until_ready(basic_block_forward(x, w1, g1, b1, w2, g2, b2))
    ref = jax.block_until_ready(_ref_forward(x, w1, g1, b1, w2, g2, b2))

    # bf16 MXU inputs + bf16 intermediate staging (f32 accumulation) => slightly
    # looser tolerance than a pure-f32 reference.
    np.testing.assert_allclose(np.asarray(out), np.asarray(ref), rtol=2e-2, atol=2e-2)

    print("KERNEL_OK")
</pallas_src>

<mosaic_0001>
module attributes {stable_mosaic.version = 11 : i64} {
  func.func @conv1_kernel(%arg0: i32, %arg1: memref<1x16x16x128xf32, #tpu.memory_space<vmem>>, %arg2: memref<9x128x128xbf16, #tpu.memory_space<vmem>>, %arg3: memref<1x16x16x128xbf16, #tpu.memory_space<vmem>>, %arg4: memref<1x2x128xf32, #tpu.memory_space<vmem>>, %arg5: memref<18x18x128xbf16, #tpu.memory_space<vmem>>) attributes {dimension_semantics = [#tpu.dimension_semantics<parallel>], iteration_bounds = array<i64: 2>, scalar_prefetch = 0 : i64, scratch_operands = 1 : i64, tpu.core_type = #tpu.core_type<tc>, window_params = [{transform_indices = @transform_0, window_bounds = array<i64: 1, 16, 16, 128>}, {pipeline_mode = #tpu.pipeline_mode<synchronous>, transform_indices = @transform_1, window_bounds = array<i64: 9, 128, 128>}, {transform_indices = @transform_2, window_bounds = array<i64: 1, 16, 16, 128>}, {transform_indices = @transform_3, window_bounds = array<i64: 1, 2, 128>}]} {
    %c0 = arith.constant 0 : index
    %c0_0 = arith.constant 0 : index
    %c0_1 = arith.constant 0 : index
    %c0_2 = arith.constant 0 : index
    %0 = vector.load %arg1[%c0, %c0_0, %c0_1, %c0_2] : memref<1x16x16x128xf32, #tpu.memory_space<vmem>>, vector<1x16x16x128xf32>
    %1 = vector.shape_cast %0 : vector<1x16x16x128xf32> to vector<16x16x128xf32>
    %2 = arith.truncf %1 : vector<16x16x128xf32> to vector<16x16x128xbf16>
    %cst = arith.constant 0.000000e+00 : bf16
    %3 = vector.broadcast %cst : bf16 to vector<1x18x128xbf16>
    %cst_3 = arith.constant 0.000000e+00 : bf16
    %4 = vector.broadcast %cst_3 : bf16 to vector<16x1x128xbf16>
    %c0_4 = arith.constant 0 : index
    %c0_5 = arith.constant 0 : index
    %c0_6 = arith.constant 0 : index
    %5 = vector.load %arg5[%c0_4, %c0_5, %c0_6] : memref<18x18x128xbf16, #tpu.memory_space<vmem>>, vector<1x18x128xbf16>
    tpu.vector_store %arg5[%c0_4, %c0_5, %c0_6], %3 {strides = array<i32>} : memref<18x18x128xbf16, #tpu.memory_space<vmem>>, vector<1x18x128xbf16>,
    %c17 = arith.constant 17 : index
    %c0_7 = arith.constant 0 : index
    %c0_8 = arith.constant 0 : index
    %6 = vector.load %arg5[%c17, %c0_7, %c0_8] : memref<18x18x128xbf16, #tpu.memory_space<vmem>>, vector<1x18x128xbf16>
    tpu.vector_store %arg5[%c17, %c0_7, %c0_8], %3 {strides = array<i32>} : memref<18x18x128xbf16, #tpu.memory_space<vmem>>, vector<1x18x128xbf16>,
    %c1 = arith.constant 1 : index
    %c0_9 = arith.constant 0 : index
    %c0_10 = arith.constant 0 : index
    %7 = vector.load %arg5[%c1, %c0_9, %c0_10] : memref<18x18x128xbf16, #tpu.memory_space<vmem>>, vector<16x1x128xbf16>
    tpu.vector_store %arg5[%c1, %c0_9, %c0_10], %4 {strides = array<i32>} : memref<18x18x128xbf16, #tpu.memory_space<vmem>>, vector<16x1x128xbf16>,
    %c1_11 = arith.constant 1 : index
    %c17_12 = arith.constant 17 : index
    %c0_13 = arith.constant 0 : index
    %8 = vector.load %arg5[%c1_11, %c17_12, %c0_13] : memref<18x18x128xbf16, #tpu.memory_space<vmem>>, vector<16x1x128xbf16>
    tpu.vector_store %arg5[%c1_11, %c17_12, %c0_13], %4 {strides = array<i32>} : memref<18x18x128xbf16, #tpu.memory_space<vmem>>, vector<16x1x128xbf16>,
    %c1_14 = arith.constant 1 : index
    %c1_15 = arith.constant 1 : index
    %c0_16 = arith.constant 0 : index
    %9 = vector.load %arg5[%c1_14, %c1_15, %c0_16] : memref<18x18x128xbf16, #tpu.memory_space<vmem>>, vector<16x16x128xbf16>
    tpu.vector_store %arg5[%c1_14, %c1_15, %c0_16], %2 {strides = array<i32>} : memref<18x18x128xbf16, #tpu.memory_space<vmem>>, vector<16x16x128xbf16>,
    %c0_17 = arith.constant 0 : index
    %c0_18 = arith.constant 0 : index
    %c0_19 = arith.constant 0 : index
    %10 = vector.load %arg5[%c0_17, %c0_18, %c0_19] : memref<18x18x128xbf16, #tpu.memory_space<vmem>>, vector<18x18x128xbf16>
    %cst_20 = arith.constant 0.000000e+00 : f32
    %11 = vector.broadcast %cst_20 : f32 to vector<256x128xf32>
    %12 = vector.extract_strided_slice %10 {offsets = [0, 0, 0], sizes = [16, 16, 128], strides = [1, 1, 1]} : vector<18x18x128xbf16> to vector<16x16x128xbf16>
    %13 = vector.shape_cast %12 : vector<16x16x128xbf16> to vector<256x128xbf16>
    %c0_21 = arith.constant 0 : index
    %c0_22 = arith.constant 0 : index
    %c0_23 = arith.constant 0 : index
    %14 = vector.load %arg2[%c0_21, %c0_22, %c0_23] : memref<9x128x128xbf16, #tpu.memory_space<vmem>>, vector<1x128x128xbf16>
    %15 = vector.shape_cast %14 : vector<1x128x128xbf16> to vector<128x128xbf16>
    %cst_24 = arith.constant dense<0.000000e+00> : vector<256x128xf32>
    %16 = tpu.matmul %13, %15, %cst_24 {dimension_numbers = #tpu.dot_dimension_numbers<[1], [0], [0], [1], [0, 0, 1, 1], [], []>} : vector<256x128xbf16>, vector<128x128xbf16>, vector<256x128xf32> -> vector<256x128xf32>
    %17 = arith.addf %11, %16 : vector<256x128xf32>
    %18 = vector.extract_strided_slice %10 {offsets = [0, 1, 0], sizes = [16, 16, 128], strides = [1, 1, 1]} : vector<18x18x128xbf16> to vector<16x16x128xbf16>
    %19 = vector.shape_cast %18 : vector<16x16x128xbf16> to vector<256x128xbf16>
    %c1_25 = arith.constant 1 : index
    %c0_26 = arith.constant 0 : index
    %c0_27 = arith.constant 0 : index
    %20 = vector.load %arg2[%c1_25, %c0_26, %c0_27] : memref<9x128x128xbf16, #tpu.memory_space<vmem>>, vector<1x128x128xbf16>
    %21 = vector.shape_cast %20 : vector<1x128x128xbf16> to vector<128x128xbf16>
    %cst_28 = arith.constant dense<0.000000e+00> : vector<256x128xf32>
    %22 = tpu.matmul %19, %21, %cst_28 {dimension_numbers = #tpu.dot_dimension_numbers<[1], [0], [0], [1], [0, 0, 1, 1], [], []>} : vector<256x128xbf16>, vector<128x128xbf16>, vector<256x128xf32> -> vector<256x128xf32>
    %23 = arith.addf %17, %22 : vector<256x128xf32>
    %24 = vector.extract_strided_slice %10 {offsets = [0, 2, 0], sizes = [16, 16, 128], strides = [1, 1, 1]} : vector<18x18x128xbf16> to vector<16x16x128xbf16>
    %25 = vector.shape_cast %24 : vector<16x16x128xbf16> to vector<256x128xbf16>
    %c2 = arith.constant 2 : index
    %c0_29 = arith.constant 0 : index
    %c0_30 = arith.constant 0 : index
    %26 = vector.load %arg2[%c2, %c0_29, %c0_30] : memref<9x128x128xbf16, #tpu.memory_space<vmem>>, vector<1x128x128xbf16>
    %27 = vector.shape_cast %26 : vector<1x128x128xbf16> to vector<128x128xbf16>
    %cst_31 = arith.constant dense<0.000000e+00> : vector<256x128xf32>
    %28 = tpu.matmul %25, %27, %cst_31 {dimension_numbers = #tpu.dot_dimension_numbers<[1], [0], [0], [1], [0, 0, 1, 1], [], []>} : vector<256x128xbf16>, vector<128x128xbf16>, vector<256x128xf32> -> vector<256x128xf32>
    %29 = arith.addf %23, %28 : vector<256x128xf32>
    %30 = vector.extract_strided_slice %10 {offsets = [1, 0, 0], sizes = [16, 16, 128], strides = [1, 1, 1]} : vector<18x18x128xbf16> to vector<16x16x128xbf16>
    %31 = vector.shape_cast %30 : vector<16x16x128xbf16> to vector<256x128xbf16>
    %c3 = arith.constant 3 : index
    %c0_32 = arith.constant 0 : index
    %c0_33 = arith.constant 0 : index
    %32 = vector.load %arg2[%c3, %c0_32, %c0_33] : memref<9x128x128xbf16, #tpu.memory_space<vmem>>, vector<1x128x128xbf16>
    %33 = vector.shape_cast %32 : vector<1x128x128xbf16> to vector<128x128xbf16>
    %cst_34 = arith.constant dense<0.000000e+00> : vector<256x128xf32>
    %34 = tpu.matmul %31, %33, %cst_34 {dimension_numbers = #tpu.dot_dimension_numbers<[1], [0], [0], [1], [0, 0, 1, 1], [], []>} : vector<256x128xbf16>, vector<128x128xbf16>, vector<256x128xf32> -> vector<256x128xf32>
    %35 = arith.addf %29, %34 : vector<256x128xf32>
    %36 = vector.extract_strided_slice %10 {offsets = [1, 1, 0], sizes = [16, 16, 128], strides = [1, 1, 1]} : vector<18x18x128xbf16> to vector<16x16x128xbf16>
    %37 = vector.shape_cast %36 : vector<16x16x128xbf16> to vector<256x128xbf16>
    %c4 = arith.constant 4 : index
    %c0_35 = arith.constant 0 : index
    %c0_36 = arith.constant 0 : index
    %38 = vector.load %arg2[%c4, %c0_35, %c0_36] : memref<9x128x128xbf16, #tpu.memory_space<vmem>>, vector<1x128x128xbf16>
    %39 = vector.shape_cast %38 : vector<1x128x128xbf16> to vector<128x128xbf16>
    %cst_37 = arith.constant dense<0.000000e+00> : vector<256x128xf32>
    %40 = tpu.matmul %37, %39, %cst_37 {dimension_numbers = #tpu.dot_dimension_numbers<[1], [0], [0], [1], [0, 0, 1, 1], [], []>} : vector<256x128xbf16>, vector<128x128xbf16>, vector<256x128xf32> -> vector<256x128xf32>
    %41 = arith.addf %35, %40 : vector<256x128xf32>
    %42 = vector.extract_strided_slice %10 {offsets = [1, 2, 0], sizes = [16, 16, 128], strides = [1, 1, 1]} : vector<18x18x128xbf16> to vector<16x16x128xbf16>
    %43 = vector.shape_cast %42 : vector<16x16x128xbf16> to vector<256x128xbf16>
    %c5 = arith.constant 5 : index
    %c0_38 = arith.constant 0 : index
    %c0_39 = arith.constant 0 : index
    %44 = vector.load %arg2[%c5, %c0_38, %c0_39] : memref<9x128x128xbf16, #tpu.memory_space<vmem>>, vector<1x128x128xbf16>
    %45 = vector.shape_cast %44 : vector<1x128x128xbf16> to vector<128x128xbf16>
    %cst_40 = arith.constant dense<0.000000e+00> : vector<256x128xf32>
    %46 = tpu.matmul %43, %45, %cst_40 {dimension_numbers = #tpu.dot_dimension_numbers<[1], [0], [0], [1], [0, 0, 1, 1], [], []>} : vector<256x128xbf16>, vector<128x128xbf16>, vector<256x128xf32> -> vector<256x128xf32>
    %47 = arith.addf %41, %46 : vector<256x128xf32>
    %48 = vector.extract_strided_slice %10 {offsets = [2, 0, 0], sizes = [16, 16, 128], strides = [1, 1, 1]} : vector<18x18x128xbf16> to vector<16x16x128xbf16>
    %49 = vector.shape_cast %48 : vector<16x16x128xbf16> to vector<256x128xbf16>
    %c6 = arith.constant 6 : index
    %c0_41 = arith.constant 0 : index
    %c0_42 = arith.constant 0 : index
    %50 = vector.load %arg2[%c6, %c0_41, %c0_42] : memref<9x128x128xbf16, #tpu.memory_space<vmem>>, vector<1x128x128xbf16>
    %51 = vector.shape_cast %50 : vector<1x128x128xbf16> to vector<128x128xbf16>
    %cst_43 = arith.constant dense<0.000000e+00> : vector<256x128xf32>
    %52 = tpu.matmul %49, %51, %cst_43 {dimension_numbers = #tpu.dot_dimension_numbers<[1], [0], [0], [1], [0, 0, 1, 1], [], []>} : vector<256x128xbf16>, vector<128x128xbf16>, vector<256x128xf32> -> vector<256x128xf32>
    %53 = arith.addf %47, %52 : vector<256x128xf32>
    %54 = vector.extract_strided_slice %10 {offsets = [2, 1, 0], sizes = [16, 16, 128], strides = [1, 1, 1]} : vector<18x18x128xbf16> to vector<16x16x128xbf16>
    %55 = vector.shape_cast %54 : vector<16x16x128xbf16> to vector<256x128xbf16>
    %c7 = arith.constant 7 : index
    %c0_44 = arith.constant 0 : index
    %c0_45 = arith.constant 0 : index
    %56 = vector.load %arg2[%c7, %c0_44, %c0_45] : memref<9x128x128xbf16, #tpu.memory_space<vmem>>, vector<1x128x128xbf16>
    %57 = vector.shape_cast %56 : vector<1x128x128xbf16> to vector<128x128xbf16>
    %cst_46 = arith.constant dense<0.000000e+00> : vector<256x128xf32>
    %58 = tpu.matmul %55, %57, %cst_46 {dimension_numbers = #tpu.dot_dimension_numbers<[1], [0], [0], [1], [0, 0, 1, 1], [], []>} : vector<256x128xbf16>, vector<128x128xbf16>, vector<256x128xf32> -> vector<256x128xf32>
    %59 = arith.addf %53, %58 : vector<256x128xf32>
    %60 = vector.extract_strided_slice %10 {offsets = [2, 2, 0], sizes = [16, 16, 128], strides = [1, 1, 1]} : vector<18x18x128xbf16> to vector<16x16x128xbf16>
    %61 = vector.shape_cast %60 : vector<16x16x128xbf16> to vector<256x128xbf16>
    %c8 = arith.constant 8 : index
    %c0_47 = arith.constant 0 : index
    %c0_48 = arith.constant 0 : index
    %62 = vector.load %arg2[%c8, %c0_47, %c0_48] : memref<9x128x128xbf16, #tpu.memory_space<vmem>>, vector<1x128x128xbf16>
    %63 = vector.shape_cast %62 : vector<1x128x128xbf16> to vector<128x128xbf16>
    %cst_49 = arith.constant dense<0.000000e+00> : vector<256x128xf32>
    %64 = tpu.matmul %61, %63, %cst_49 {dimension_numbers = #tpu.dot_dimension_numbers<[1], [0], [0], [1], [0, 0, 1, 1], [], []>} : vector<256x128xbf16>, vector<128x128xbf16>, vector<256x128xf32> -> vector<256x128xf32>
    %65 = arith.addf %59, %64 : vector<256x128xf32>
    %66 = vector.shape_cast %65 : vector<256x128xf32> to vector<1x16x16x128xf32>
    %67 = arith.truncf %66 : vector<1x16x16x128xf32> to vector<1x16x16x128xbf16>
    %c0_50 = arith.constant 0 : index
    %c0_51 = arith.constant 0 : index
    %c0_52 = arith.constant 0 : index
    %c0_53 = arith.constant 0 : index
    %68 = vector.load %arg3[%c0_50, %c0_51, %c0_52, %c0_53] : memref<1x16x16x128xbf16, #tpu.memory_space<vmem>>, vector<1x16x16x128xbf16>
    tpu.vector_store %arg3[%c0_50, %c0_51, %c0_52, %c0_53], %67 {strides = array<i32>} : memref<1x16x16x128xbf16, #tpu.memory_space<vmem>>, vector<1x16x16x128xbf16>,
    %cst_54 = arith.constant dense<0.000000e+00> : vector<128xf32>
    %69 = vector.multi_reduction <add>, %65, %cst_54 [0] : vector<256x128xf32> to vector<128xf32>
    %70 = vector.shape_cast %69 : vector<128xf32> to vector<1x128xf32>
    %71 = vector.shape_cast %70 : vector<1x128xf32> to vector<1x1x128xf32>
    %c0_55 = arith.constant 0 : index
    %c0_56 = arith.constant 0 : index
    %c0_57 = arith.constant 0 : index
    %72 = vector.load %arg4[%c0_55, %c0_56, %c0_57] : memref<1x2x128xf32, #tpu.memory_space<vmem>>, vector<1x1x128xf32>
    tpu.vector_store %arg4[%c0_55, %c0_56, %c0_57], %71 {strides = array<i32>} : memref<1x2x128xf32, #tpu.memory_space<vmem>>, vector<1x1x128xf32>,
    %73 = arith.mulf %65, %65 : vector<256x128xf32>
    %cst_58 = arith.constant dense<0.000000e+00> : vector<128xf32>
    %74 = vector.multi_reduction <add>, %73, %cst_58 [0] : vector<256x128xf32> to vector<128xf32>
    %75 = vector.shape_cast %74 : vector<128xf32> to vector<1x128xf32>
    %76 = vector.shape_cast %75 : vector<1x128xf32> to vector<1x1x128xf32>
    %c0_59 = arith.constant 0 : index
    %c1_60 = arith.constant 1 : index
    %c0_61 = arith.constant 0 : index
    %77 = vector.load %arg4[%c0_59, %c1_60, %c0_61] : memref<1x2x128xf32, #tpu.memory_space<vmem>>, vector<1x1x128xf32>
    tpu.vector_store %arg4[%c0_59, %c1_60, %c0_61], %76 {strides = array<i32>} : memref<1x2x128xf32, #tpu.memory_space<vmem>>, vector<1x1x128xf32>,
    return
  }
  func.func @transform_0(%arg0: i32) -> (i32, i32, i32, i32) {
    %c0_i32 = arith.constant 0 : i32
    %c0_i32_0 = arith.constant 0 : i32
    %c0_i32_1 = arith.constant 0 : i32
    %c0_i32_2 = arith.constant 0 : i32
    return %arg0, %c0_i32, %c0_i32_0, %c0_i32_1 : i32, i32, i32, i32
  }
  func.func @transform_1(%arg0: i32) -> (i32, i32, i32) {
    %c0_i32 = arith.constant 0 : i32
    %c0_i32_0 = arith.constant 0 : i32
    %c0_i32_1 = arith.constant 0 : i32
    %c0_i32_2 = arith.constant 0 : i32
    return %c0_i32, %c0_i32_0, %c0_i32_1 : i32, i32, i32
  }
  func.func @transform_2(%arg0: i32) -> (i32, i32, i32, i32) {
    %c0_i32 = arith.constant 0 : i32
    %c0_i32_0 = arith.constant 0 : i32
    %c0_i32_1 = arith.constant 0 : i32
    %c0_i32_2 = arith.constant 0 : i32
    return %arg0, %c0_i32, %c0_i32_0, %c0_i32_1 : i32, i32, i32, i32
  }
  func.func @transform_3(%arg0: i32) -> (i32, i32, i32) {
    %c0_i32 = arith.constant 0 : i32
    %c0_i32_0 = arith.constant 0 : i32
    %c0_i32_1 = arith.constant 0 : i32
    return %arg0, %c0_i32, %c0_i32_0 : i32, i32, i32
  }
}

</mosaic_0001>

<bundles_post_ra>
// kernel: tpu_custom_call.1
= control target key start
LH: loop header
LB: loop body
LE: loop exit
PB: predicated region body
PF: predicated region fallthrough
CT: control target
= control target key end

     0   :  { %9 = vsyncpa [#allocation4], 0  ;;  %s7318_s0 = inlined_call_operand.hbm [shape: f32[2,16,16,128], index: 0, kind: input, shape index: {}]   ;;  %s7319_s1 = inlined_call_operand.hbm [shape: bf16[9,128,128], index: 1, kind: input, shape index: {}]   ;;  %s7320_s2 = inlined_call_operand.hbm [shape: bf16[2,16,16,128], index: 2, kind: output, shape index: {0}]   ;;  %s7321_s3 = inlined_call_operand.hbm [shape: f32[2,2,128], index: 3, kind: output, shape index: {1}]  }
   0x1   :  { %11 = vsyncpa [#allocation4 + $0x1], 0 }
   0x2   :  { %12 = vsyncpa [#allocation7], 0 }
   0x3   :  { %13 = vsyncpa [#allocation5], 0 }
   0x4   :  { %15 = vsyncpa [#allocation5 + $0x1], 0 }
   0x5   :  { %16 = vsyncpa [#allocation10], 0 }
   0x6   :  { %18 = vsyncpa [#allocation10 + $0x1], 0  ;;  %s6139_s12 = smov 0   ;;  %s6141_s13 = smov 0  }
   0x7   :  { %s6143_s14 = smov 0   ;;  %s6145_s15 = smov 0  }
   0x8 LB: > { %s6160_s16 = sadd.s32 4294967295, %s6106_s15   ;;  %s4449_s17 = sadd.s32 4294967294, %s6106_s15   ;;  %s6106_s15 = sphi %s6145_s15, %s7377_s15   ;;  %s6102_s14 = sphi %s6143_s14, %s7376_s14   ;;  %s6098_s13 = sphi %s6141_s13, %s7375_s13   ;;  %s6094_s12 = sphi %s6139_s12, %s7374_s12  }
   0x9   : > { %p44_p0 = scmp.ne.s32.totalorder %s6098_s13, %s6094_s12  ;;  %p7322_p1 = scmp.eq.s32.totalorder %s6160_s16, 0 }
   0xa   : > { %p95_p3 = scmp.eq.s32.totalorder %s4449_s17, 1  ;;  %p4450_p5 = scmp.ge.s32.totalorder %s6106_s15, 1 }
   0xb   : > { %p6169_p4 = por %p7322_p1, %p44_p0  ;;  %p128_p7 = scmp.lt.s32.totalorder %s6106_s15, 3 }
   0xc   : > { %p6174_p6 = por %p95_p3, %p44_p0  ;;  %s6108_s21 = smov [#allocation6]  }
   0xd   : > { %s7337_s18 = scalar_select %p6169_p4, 1, 0 }
   0xe   : > { %s7338_s19 = scalar_select %p6174_p6, 1, 0 }
   0xf   : > { %p6179_p8 = pnand %p4450_p5, %p128_p7  ;;  %s140_s22 = sshll.u32 %s6108_s21, 4  ;;  %s6183_s22 = int_to_ptr.vmem [resolvable:$true] %s140_s22 }
  0x10   : > { %s6195_s24 = sadd.s32 1, %s6106_s15   ;;  %s31_s25 = sadd.s32 1, %s6102_s14 }
  0x11   : > { %s7339_s20 = scalar_select %p6179_p8, 1, 0 }
  0x12   : > { %p5767_p9 = pneg %p6179_p8  ;;  %s28_s26 = ssub.s32 %s6106_s15, %s6195_s24 }
  0x13   : > { %s5946_s29 = scalar_lea.hbm %s7319_s1, 9216 }
  0x14   : > { %p6190_p11 = pnand %p5767_p9, %p7322_p1  ;;  %p5947_p12 = scmp.ne.s32.totalorder %s7319_s1, %s5946_s29 }
  0x15   : > { %p5953_p5 = scmp.lt.u32.totalorder %s5946_s29, %s7319_s1 }
  0x16   : > { %p5948_p13 = pneg %p6190_p11 }
  0x18   : > { %p5949_p0 = pnand %p5948_p13, %p5947_p12 }
  0x1a   : > { %p5950_p3 = pneg %p5949_p0 }
  0x1c   : > { %p5955_p7 = pnand %p5953_p5, %p5950_p3 }
  0x1e   : > { %5958 = shalt.err (!%p5955_p7)
}
  0x1f   : > { %s5959_s7 = scalar_lea.vmem %s6183_s22, 9216  ;;  %p5967_p2 = scmp.lt.s32.totalorder %s6183_s22, %s6183_s22 }
  0x20   : > { %p5960_p9 = scmp.ne.s32.totalorder %s6183_s22, %s5959_s7  ;;  %p5968_p6 = scmp.lt.s32.totalorder %s5959_s7, %s5959_s7 }
  0x22   : > { %p5962_p10 = pnand %p5960_p9, %p5948_p13  ;;  %p5969_p4 = por %p5968_p6, %p5967_p2 }
  0x24   : > { %p5963_p1 = pneg %p5962_p10 }
  0x26   : > { %p5970_p8 = pnand %p5969_p4, %p5963_p1 }
  0x28   : > { %5973 = shalt.err (!%p5970_p8)
}
  0x29   : > { %s6109_s8 = smov 64   ;;  %s6110_s9 = smov 4  }
  0x2a   : > { %5770 = dma.hbm_to_vmem [thread:$0]  (!%p6190_p11), %s7319_s1, 9216, %s6183_s22, [#allocation7], %s6109_s8, %s6109_s8, %s6110_s9  }
  0x2b   : > { %p29_p2 = scmp.eq.s32.totalorder %s28_s26, 0  ;;  %p38_p1 = scmp.ne.s32.totalorder %s6102_s14, %s6098_s13 }
  0x2c   : > { %p39_p4 = scmp.eq.s32.totalorder %s6106_s15, 0  ;;  %p5783_p6 = scmp.lt.s32.totalorder %s6106_s15, 2 }
  0x2d   : > { %s6226_s17 = scalar_select %p29_p2, %s6102_s14, %s31_s25  }
  0x2e   : > { %p40_p8 = por %p39_p4, %p38_p1  ;;  %p7341_p10 = scmp.eq.s32.totalorder %s6160_s16, 1 }
  0x2f   : > { %s154_s27 = sand.u32 1, %s6102_s14   ;;  %s4676_s28 = sshll.u32 %s6106_s15, 12 }
  0x30   : > { %p6230_p12 = por %p7341_p10, %p38_p1  ;;  %s4453_s29 = sshll.u32 %s154_s27, 8 }
  0x31   : > { %s6239_s4 = scalar_lea.hbm %s7318_s0, %s4676_s28  ;;  %s158_s22 = scalar_lea.vmem [#allocation3], %s4453_s29 }
  0x32   : > { %s165_s25 = sshll.u32 %s158_s22, 4  ;;  %p6241_p11 = pnand %p5783_p6, %p40_p8  ;;  %s6245_s25 = int_to_ptr.vmem [resolvable:$true] %s165_s25 }
  0x33   : > { %s6247_s5 = scalar_lea.sflag [#allocation4], %s154_s27  ;;  %s5974_s6 = scalar_lea.hbm %s6239_s4, 4096 }
  0x34   : > { %p5975_p13 = scmp.ne.s32.totalorder %s6239_s4, %s5974_s6  ;;  %p5976_p0 = pneg %p6241_p11 }
  0x35   : > { %s5979_s9 = scalar_lea.hbm %s7318_s0, 8192  ;;  %p5980_p7 = scmp.lt.u32.totalorder %s6239_s4, %s7318_s0 }
  0x36   : > { %p5977_p3 = pnand %p5976_p0, %p5975_p13  ;;  %p5981_p9 = scmp.lt.u32.totalorder %s5979_s9, %s5974_s6 }
  0x37   : > { %p5983_p1 = scmp.lt.u32.totalorder %s5974_s6, %s6239_s4 }
  0x38   : > { %p5978_p5 = pneg %p5977_p3  ;;  %p5982_p2 = por %p5981_p9, %p5980_p7 }
  0x3a   : > { %p5984_p4 = por %p5983_p1, %p5982_p2 }
  0x3c   : > { %p5985_p6 = pnand %p5984_p4, %p5978_p5 }
  0x3e   : > { %5988 = shalt.err (!%p5985_p6)
}
  0x3f   : > { %s5989_s27 = scalar_lea.vmem %s6245_s25, 4096  ;;  %s6111_s28 = smov [#allocation3]  }
  0x40   : > { %p5990_p8 = scmp.ne.s32.totalorder %s6245_s25, %s5989_s27  ;;  %s5994_s29 = sshll.u32 %s6111_s28, 4  ;;  %s5995_s29 = int_to_ptr.vmem [resolvable:$false] %s5994_s29 }
  0x41   : > { %s5996_s23 = scalar_lea.vmem %s5995_s29, 8192  ;;  %p5997_p3 = scmp.lt.s32.totalorder %s6245_s25, %s5995_s29 }
  0x42   : > { %p5992_p10 = pnand %p5990_p8, %p5976_p0  ;;  %p5998_p7 = scmp.lt.s32.totalorder %s5996_s23, %s5989_s27 }
  0x44   : > { %p5993_p13 = pneg %p5992_p10  ;;  %p5999_p9 = por %p5998_p7, %p5997_p3 }
  0x46   : > { %p6000_p2 = pnand %p5999_p9, %p5993_p13 }
  0x48   : > { %6003 = shalt.err (!%p6000_p2)
}
  0x49   : > { %s6112_s30 = smov 128   ;;  %s6113_s22 = smov 8  }
  0x4a   : > { %5774 = dma.hbm_to_vmem [thread:$0]  (!%p6241_p11), %s6239_s4, 4096, %s6245_s25, %s6247_s5, %s6112_s30, %s6112_s30, %s6113_s22  }
  0x4b   : > { %p7344_p0 = scmp.ne.s32.totalorder %s7339_s20, 0 }
  0x4d   : > { %177 = sbr.rel (%p7344_p0) target bundleno = 752 (0x2f0), region = 28 }
  0x54   : > { %s6278_s6 = sand.u32 1, %s6098_s13   ;;  %p7345_p5 = scmp.ne.s32.totalorder %s7337_s18, 0 }
  0x55   : > { %s4457_s7 = sshll.u32 %s6278_s6, 8  ;;  %s180_s8 = scalar_lea.sflag [#allocation4], %s6278_s6 }
  0x56   : > { %s6282_s9 = scalar_lea.vmem [#allocation3], %s4457_s7 }
  0x57   : > { %6077 = dma.done.wait (%p7345_p5), %s180_s8, 4096  }
  0x58   : > { %6079 = vsyncadd (%p7345_p5), %s180_s8, 4294963200  ;;  %p7346_p11 = scmp.eq.s32.totalorder %s6160_s16, 0 }
  0x5a   : > { %6081 = dma.done.wait (%p7346_p11), [#allocation7], 9216   ;;  %p7347_p1 = pmov %p7346_p11 }
  0x5b   : > { %v6114_v0 = vmov 0   ;;  %v5826_v1 = vld [vmem:[#allocation6 + $0x40] sm:$0xff]   ;;  %v5828_v3 = vld [vmem:[#allocation6 + $0x48] sm:$0xff]   ;;  %v5830_v5 = vld [vmem:[#allocation6 + $0x50] sm:$0xff]   ;;  %vm273_vm0 = vsmask.f32 256 }
  0x5c   : > { %6083 = vsyncadd (%p7347_p1), [#allocation7], 4294958080  ;;  %264 = vst [vmem:[#allocation2] sm:$0xf] %v6114_v0  ;;  %v5827_v2 = vld [vmem:[#allocation6 + $0x100] sm:$0xff]   ;;  %5053 = vmatprep.subr.bf16.mxu1 %v5826_v1  ;;  %v5829_v4 = vld [vmem:[#allocation6 + $0x108] sm:$0xff]  }
  0x5d   : > { %265 = vst [vmem:[#allocation2 + $0x4] sm:$0xf] %v6114_v0  ;;  %266 = vst [vmem:[#allocation2 + $0x8] sm:$0x1] %v6114_v0  ;;  %5245 = vmatprep.subr.bf16.mxu0 %v5827_v2  ;;  %5054 = vmatpush3.bf16.msra.mxu1 %v5826_v1  ;;  %v5831_v6 = vld [vmem:[#allocation6 + $0x110] sm:$0xff]   ;;  %v5832_v7 = vld [vmem:[#allocation6 + $0x58] sm:$0xff]  }
  0x5e   : > { %268 = vst [vmem:[#allocation2 + $0xcc] sm:$0xf] %v6114_v0  ;;  %269 = vst [vmem:[#allocation2 + $0xd0] sm:$0xf] %v6114_v0  ;;  %5246 = vmatpush3.bf16.msra.mxu0 %v5827_v2  ;;  %5055 = vmatprep.subr.bf16.mxu1 %v5828_v3  ;;  %vm272_vm1 = vcmask 1040384   ;;  %v5833_v8 = vld [vmem:[#allocation6 + $0x118] sm:$0xff]  }
  0x5f   : > { %270 = vst [vmem:[#allocation2 + $0xd4] sm:$0x1] %v6114_v0  ;;  %5247 = vmatprep.subr.bf16.mxu0 %v5829_v4  ;;  %vm959_vm2 = vsmask.f32 3328  ;;  %vm960_vm3 = vsmask.f32 7440  ;;  %vm6294_vm4 = vmand %vm272_vm1, %vm273_vm0 }
  0x60   : > { %vm323_vm5 = vsmask.f32 7938  ;;  %v5834_v10 = vld [vmem:[#allocation6 + $0x60] sm:$0xff]   ;;  %vm453_vm6 = vsmask.f32 4368  ;;  %v5836_v12 = vld [vmem:[#allocation6 + $0x68] sm:$0xff]   ;;  %vm6314_vm9 = vmor %vm959_vm2, %vm960_vm3 }
  0x61   : > { %5056 = vmatpush3.bf16.msra.mxu1 %v5828_v3  ;;  %v5835_v11 = vld [vmem:[#allocation6 + $0x120] sm:$0xff]   ;;  %v5837_v13 = vld [vmem:[#allocation6 + $0x128] sm:$0xff]   ;;  %vm775_vm7 = vcmask 1043456   ;;  %vm6302_vm8 = vmand %vm272_vm1, %vm323_vm5  ;;  %vm1957_vm12 = vcmask 1042432   ;;  %vm1958_vm13 = vcmask 1046532   ;;  %s4459_s18 = sshll.u32 %s6278_s6, 7 }
  0x62   : > { %5248 = vmatpush3.bf16.msra.mxu0 %v5829_v4  ;;  %5057 = vmatprep.subr.bf16.mxu1 %v5830_v5  ;;  %v216_v21 = vld [vmem:[%s6282_s9] sm:$0xff]  ;;  %v217_v22 = vld [vmem:[%s6282_s9 + $0x8] sm:$0xff]  ;;  %v5838_v24 = vld [vmem:[#allocation6 + $0x70] sm:$0xff]   ;;  %s7214_s20 = scalar_lea.vmem [#allocation8], %s4459_s18  ;;  %s4741_s4 = sshll.u32 %s6160_s16, 11 }
  0x63   : > { %5249 = vmatprep.subr.bf16.mxu0 %v5831_v6  ;;  %v889_v14 = vld [vmem:[#allocation2] sm:$0xf]  ;;  %v275_v26 = vld [vmem:[#allocation2 + $0xc] sm:$0x1]  ;;  %v325_v27 = vld [vmem:[#allocation2 + $0x14] sm:$0x1]  ;;  %v4677_v28 = vpack.c.bf16 %v216_v21, %v216_v21  ;;  %v4678_v29 = vpack.c.bf16 %v217_v22, %v217_v22  ;;  %s7239_s10 = scalar_lea.hbm %s7320_s2, %s4741_s4 }
  0x64   : > { %v890_v15 = vld [vmem:[#allocation2 + $0x4] sm:$0xf]  ;;  %v891_v16 = vld [vmem:[#allocation2 + $0x8] sm:$0x1]  ;;  %v963_v17 = vshrl.u32 %v889_v14, 16  ;;  %v966_v18 = vshll.u32 %v889_v14, 16  ;;  %vm6320_vm10 = vmor %vm273_vm0, %vm453_vm6 }
  0x65   : > { %5058 = vmatpush3.bf16.msra.mxu1 %v5830_v5  ;;  %v972_v19 = vshll.u32 %v890_v15, 16  ;;  %v976_v20 = vshrl.u32 %v890_v15, 16  ;;  %v982_v25 = vshll.u32 %v891_v16, 16  ;;  %v276_v35 = vsel %vm6294_vm4, 0, %v275_v26  ;;  %v5839_v38 = vld [vmem:[#allocation6 + $0x130] sm:$0xff]   ;;  %v219_v44 = vld [vmem:[%s6282_s9 + $0x18] sm:$0xff]  ;;  %vm6328_vm11 = vmand %vm775_vm7, %vm323_vm5 }
  0x66   : > { %5250 = vmatpush3.bf16.msra.mxu0 %v5831_v6  ;;  %5059 = vmatprep.subr.bf16.mxu1 %v5832_v7  ;;  %v965_v30 = vrot.slane %v963_v17, 4  ;;  %v968_v31 = vrot.slane %v966_v18, 5  ;;  %v326_v36 = vsel %vm6302_vm8, 0, %v325_v27  ;;  %v456_v37 = vshrl.u32 %v4677_v28, 16  ;;  %277 = vst [vmem:[#allocation2 + $0xc] sm:$0x1] %v276_v35  ;;  %vm6578_vm14 = vmor %vm1957_vm12, %vm1958_vm13 }
  0x67   : > { %5251 = vmatprep.subr.bf16.mxu0 %v5833_v8  ;;  %v974_v32 = vrot.slane %v972_v19, 5  ;;  %v978_v33 = vrot.slane %v976_v20, 4  ;;  %v984_v34 = vrot.slane %v982_v25, 5  ;;  %327 = vst [vmem:[#allocation2 + $0x14] sm:$0x1] %v326_v36  ;;  %v459_v41 = vshll.u32 %v4677_v28, 16 }
  0x68   : > { %v969_v39 = vor.u32 %v968_v31, %v965_v30  ;;  %v464_v42 = vshrl.u32 %v4678_v29, 16  ;;  %v218_v43 = vld [vmem:[%s6282_s9 + $0x10] sm:$0xff]  ;;  %v458_v46 = vrot.slane %v456_v37, 7  ;;  %v467_v47 = vshll.u32 %v4678_v29, 16  ;;  %v278_v48 = vld [vmem:[#allocation2 + $0x18] sm:$0x1] }
  0x69   : > { %5060 = vmatpush3.bf16.msra.mxu1 %v5832_v7  ;;  %v979_v40 = vor.u32 %v978_v33, %v974_v32  ;;  %v328_v49 = vld [vmem:[#allocation2 + $0x20] sm:$0x1]  ;;  %v4679_v50 = vpack.c.bf16 %v218_v43, %v218_v43  ;;  %v4680_v51 = vpack.c.bf16 %v219_v44, %v219_v44  ;;  %v279_v56 = vsel %vm6294_vm4, 0, %v278_v48  ;;  %v5840_v57 = vld [vmem:[#allocation6 + $0x78] sm:$0xff]   ;;  %v6338_v5 = vld [vmem:[#allocation6] sm:$0xff]   ;;  %s4321_s25 = sshll.u32 %s7214_s20, 4  ;;  %s7241_s25 = int_to_ptr.vmem [resolvable:$true] %s4321_s25 }
  0x6a   : > { %5252 = vmatpush3.bf16.msra.mxu0 %v5833_v8  ;;  %5061 = vmatprep.subr.bf16.mxu1 %v5834_v10  ;;  %v970_v52 = vrot.slane %v969_v39, 4  ;;  %v466_v55 = vrot.slane %v464_v42, 7  ;;  %v461_v58 = vor.u32 %v459_v41, %v458_v46  ;;  %v462_v59 = vrot.slane %v458_v46, 4  ;;  %280 = vst [vmem:[#allocation2 + $0x18] sm:$0x1] %v279_v56  ;;  %v5841_v63 = vld [vmem:[#allocation6 + $0x138] sm:$0xff]  }
  0x6b   : > { %5253 = vmatprep.subr.bf16.mxu0 %v5835_v11  ;;  %v980_v53 = vrot.slane %v979_v40, 4  ;;  %v329_v61 = vsel %vm6302_vm8, 0, %v328_v49  ;;  %v473_v62 = vshrl.u32 %v4679_v50, 16  ;;  %v476_v7 = vshll.u32 %v4679_v50, 16  ;;  %v6344_v14 = vld [vmem:[#allocation6 + $0x140] sm:$0xff]   ;;  %v222_v19 = vld [vmem:[%s6282_s9 + $0x30] sm:$0xff] }
  0x6c   : > { %v975_v0 = vsel %vm6314_vm9, %v970_v52, %v974_v32  ;;  %v469_v2 = vor.u32 %v467_v47, %v466_v55  ;;  %v471_v3 = vrot.slane %v466_v55, 4  ;;  %330 = vst [vmem:[#allocation2 + $0x20] sm:$0x1] %v329_v61  ;;  %v481_v8 = vshrl.u32 %v4680_v51, 16  ;;  %v281_v15 = vld [vmem:[#allocation2 + $0x24] sm:$0x1] }
  0x6d   : > { %5062 = vmatpush3.bf16.msra.mxu1 %v5834_v10  ;;  %v985_v1 = vsel %vm6314_vm9, %v980_v53, %v984_v34  ;;  %v475_v6 = vrot.slane %v473_v62, 7  ;;  %v220_v10 = vld [vmem:[%s6282_s9 + $0x20] sm:$0xff]  ;;  %v331_v16 = vld [vmem:[#allocation2 + $0x2c] sm:$0x1]  ;;  %v282_v29 = vsel %vm6294_vm4, 0, %v281_v15  ;;  %v223_v35 = vld [vmem:[%s6282_s9 + $0x38] sm:$0xff] }
  0x6e   : > { %5254 = vmatpush3.bf16.msra.mxu0 %v5835_v11  ;;  %5063 = vmatprep.subr.bf16.mxu1 %v5836_v12  ;;  %v4493_v4 = vcombine.low %v975_v0, %v985_v1  ;;  %v221_v11 = vld [vmem:[%s6282_s9 + $0x28] sm:$0xff]  ;;  %v4681_v17 = vpack.c.bf16 %v220_v10, %v220_v10  ;;  %v777_v20 = vld [vmem:[#allocation2 + $0xc] sm:$0xf]  ;;  %v781_v21 = vld [vmem:[#allocation2 + $0x14] sm:$0x1]  ;;  %v483_v26 = vrot.slane %v481_v8, 7  ;;  %v6358_v41 = vpack.c.bf16 %v223_v35, %v223_v35 }
  0x6f   : > { %5255 = vmatprep.subr.bf16.mxu0 %v5837_v13  ;;  %v4682_v18 = vpack.c.bf16 %v221_v11, %v221_v11  ;;  %v478_v22 = vor.u32 %v476_v7, %v475_v6  ;;  %v479_v25 = vrot.slane %v475_v6, 4  ;;  %v778_v27 = vsel %vm6328_vm11, %v461_v58, %v777_v20  ;;  %283 = vst [vmem:[#allocation2 + $0x24] sm:$0x1] %v282_v29  ;;  %v284_v36 = vld [vmem:[#allocation2 + $0x30] sm:$0x1]  ;;  %s4303_s11 = scalar_lea.sflag [#allocation5], %s6278_s6 }
  0x70   : > { %5069 = vmatprep.mubr.bf16.mxu1 %v4493_v4  ;;  %v782_v28 = vsel %vm6294_vm4, %v471_v3, %v781_v21  ;;  %v332_v30 = vsel %vm6302_vm8, 0, %v331_v16  ;;  %779 = vst [vmem:[#allocation2 + $0xc] sm:$0xf] %v778_v27  ;;  %v488_v32 = vrot.slane %v483_v26, 4  ;;  %v490_v33 = vshrl.u32 %v4681_v17, 16  ;;  %v225_v4 = vld [vmem:[%s6282_s9 + $0x48] sm:$0xff] }
  0x71   : > { %5064 = vmatpush3.bf16.msra.mxu1 %v5836_v12  ;;  %v470_v12 = vsel %vm6320_vm10, %v462_v59, %v469_v2  ;;  %783 = vst [vmem:[#allocation2 + $0x14] sm:$0x1] %v782_v28  ;;  %333 = vst [vmem:[#allocation2 + $0x2c] sm:$0x1] %v332_v30  ;;  %v493_v34 = vshll.u32 %v4681_v17, 16  ;;  %v501_v39 = vshll.u32 %v4682_v18, 16 }
  0x72   : > { %5256 = vmatpush3.bf16.msra.mxu0 %v5837_v13  ;;  %5065 = vmatprep.subr.bf16.mxu1 %v5838_v24  ;;  %v484_v13 = vshll.u32 %v4680_v51, 16  ;;  %780 = vst [vmem:[#allocation2 + $0x10] sm:$0xf] %v470_v12  ;;  %v784_v37 = vld [vmem:[#allocation2 + $0x18] sm:$0xf]  ;;  %v285_v40 = vsel %vm6294_vm4, 0, %v284_v36  ;;  %v6390_v12 = vpack.c.bf16 %v225_v4, %v225_v4 }
  0x73   : > { %5257 = vmatprep.subr.bf16.mxu0 %v5839_v38  ;;  %v785_v43 = vsel %vm6328_vm11, %v478_v22, %v784_v37  ;;  %v788_v44 = vld [vmem:[#allocation2 + $0x20] sm:$0x1]  ;;  %v492_v46 = vrot.slane %v490_v33, 7  ;;  %286 = vst [vmem:[#allocation2 + $0x30] sm:$0x1] %v285_v40  ;;  %v515_v56 = vshrl.u32 %v6358_v41, 16 }
  0x74   : > { %v486_v31 = vor.u32 %v484_v13, %v483_v26  ;;  %v334_v47 = vld [vmem:[#allocation2 + $0x38] sm:$0x1]  ;;  %786 = vst [vmem:[#allocation2 + $0x18] sm:$0xf] %v785_v43  ;;  %v789_v49 = vsel %vm6294_vm4, %v488_v32, %v788_v44  ;;  %v287_v40 = vld [vmem:[#allocation2 + $0x3c] sm:$0x1] }
  0x75   : > { %5066 = vmatpush3.bf16.msra.mxu1 %v5838_v24  ;;  %v4683_v24 = vpack.c.bf16 %v222_v19, %v222_v19  ;;  %v335_v51 = vsel %vm6302_vm8, 0, %v334_v47  ;;  %790 = vst [vmem:[#allocation2 + $0x20] sm:$0x1] %v789_v49  ;;  %v496_v53 = vrot.slane %v492_v46, 4  ;;  %v495_v59 = vor.u32 %v493_v34, %v492_v46  ;;  %v5876_v54 = vld [vmem:[#allocation6 + $0x98] sm:$0xff]   ;;  %s6004_s27 = scalar_lea.vmem %s7241_s25, 2048 }
  0x76   : > { %5258 = vmatpush3.bf16.msra.mxu0 %v5839_v38  ;;  %5067 = vmatprep.subr.bf16.mxu1 %v5840_v57  ;;  %v498_v38 = vshrl.u32 %v4682_v18, 16  ;;  %v487_v42 = vsel %vm6320_vm10, %v479_v25, %v486_v31  ;;  %336 = vst [vmem:[#allocation2 + $0x38] sm:$0x1] %v335_v51  ;;  %v791_v10 = vld [vmem:[#allocation2 + $0x24] sm:$0xf]  ;;  %v517_v22 = vrot.slane %v515_v56, 7  ;;  %p6005_p4 = scmp.ne.s32.totalorder %s7241_s25, %s6004_s27 }
  0x77   : > { %5259 = vmatprep.subr.bf16.mxu0 %v5841_v63  ;;  %v507_v48 = vshrl.u32 %v4683_v24, 16  ;;  %787 = vst [vmem:[#allocation2 + $0x1c] sm:$0xf] %v487_v42  ;;  %v510_v52 = vshll.u32 %v4683_v24, 16  ;;  %v6382_v6 = vld [vmem:[#allocation2 + $0xc] sm:$0xf]  ;;  %v792_v20 = vsel %vm6328_vm11, %v495_v59, %v791_v10 }
  0x78   : > { %v500_v50 = vrot.slane %v498_v38, 7  ;;  %v6384_v7 = vld [vmem:[#allocation2 + $0x14] sm:$0x1]  ;;  %v987_v13 = vshrl.u32 %v6382_v6, 16  ;;  %v990_v15 = vshll.u32 %v6382_v6, 16  ;;  %v522_v56 = vrot.slane %v517_v22, 4  ;;  %p6006_p6 = pnand %p6005_p4, %p6230_p12 }
  0x79   : > { %5068 = vmatpush3.bf16.msra.mxu1 %v5840_v57  ;;  %v6370_v55 = vrot.slane %v507_v48, 7  ;;  %v224_v57 = vld [vmem:[%s6282_s9 + $0x40] sm:$0xff]  ;;  %v6374_v58 = vld [vmem:[#allocation2 + $0x10] sm:$0xf]  ;;  %v795_v18 = vld [vmem:[#allocation2 + $0x2c] sm:$0x1] }
  0x7a   : > { %5260 = vmatpush3.bf16.msra.mxu0 %v5841_v63  ;;  %5101 = vmatprep.subr.bf16.mxu1 %v6338_v5  ;;  %v503_v61 = vor.u32 %v501_v39, %v500_v50  ;;  %v505_v62 = vrot.slane %v500_v50, 4  ;;  %v518_v63 = vshll.u32 %v6358_v41, 16  ;;  %v996_v0 = vshll.u32 %v6374_v58, 16  ;;  %v798_v25 = vld [vmem:[#allocation2 + $0x30] sm:$0xf]  ;;  %p6007_p8 = pneg %p6006_p6  ;;  %s6115_s28 = smov [#allocation8]  }
  0x7b   : > { %5293 = vmatprep.subr.bf16.mxu0 %v6344_v14  ;;  %v1000_v1 = vshrl.u32 %v6374_v58, 16  ;;  %v512_v2 = vor.u32 %v510_v52, %v6370_v55  ;;  %v513_v3 = vrot.slane %v6370_v55, 4  ;;  %v6388_v11 = vpack.c.bf16 %v224_v57, %v224_v57  ;;  %v6399_v28 = vld [vmem:[#allocation2 + $0x18] sm:$0xf]  ;;  %793 = vst [vmem:[#allocation2 + $0x24] sm:$0xf] %v792_v20 }
  0x7c   : > { %v504_v8 = vsel %vm6320_vm10, %v496_v53, %v503_v61  ;;  %v998_v16 = vrot.slane %v996_v0, 5  ;;  %v1006_v19 = vshll.u32 %v6384_v7, 16  ;;  %v796_v21 = vsel %vm6294_vm4, %v505_v62, %v795_v18  ;;  %v6405_v32 = vld [vmem:[#allocation2 + $0x20] sm:$0x1]  ;;  %v5945_v45 = vld [vmem:[#allocation6 + $0x138] sm:$0xff]   ;;  %s6008_s29 = sshll.u32 %s6115_s28, 4  ;;  %s6009_s29 = int_to_ptr.vmem [resolvable:$false] %s6008_s29 }
  0x7d   : > { %v1002_v17 = vrot.slane %v1000_v1, 4  ;;  %794 = vst [vmem:[#allocation2 + $0x28] sm:$0xf] %v504_v8  ;;  %v989_v26 = vrot.slane %v987_v13, 4  ;;  %v992_v24 = vrot.slane %v990_v15, 5  ;;  %v799_v30 = vsel %vm6328_vm11, %v512_v2, %v798_v25  ;;  %s6010_s23 = scalar_lea.vmem %s6009_s29, 4096  ;;  %p6011_p10 = scmp.lt.s32.totalorder %s7241_s25, %s6009_s29 }
  0x7e   : > { %v6401_v29 = vld [vmem:[#allocation2 + $0x1c] sm:$0xf]  ;;  %797 = vst [vmem:[#allocation2 + $0x2c] sm:$0x1] %v796_v21  ;;  %v1008_v31 = vrot.slane %v1006_v19, 5  ;;  %v1011_v33 = vshrl.u32 %v6399_v28, 16  ;;  %v520_v53 = vor.u32 %v518_v63, %v517_v22  ;;  %p6012_p13 = scmp.lt.s32.totalorder %s6010_s23, %s6004_s27 }
  0x7f   : > { %v1003_v27 = vor.u32 %v1002_v17, %v998_v16  ;;  %v1014_v34 = vshll.u32 %v6399_v28, 16  ;;  %v1020_v35 = vshll.u32 %v6401_v29, 16  ;;  %800 = vst [vmem:[#allocation2 + $0x30] sm:$0xf] %v799_v30  ;;  %v993_v36 = vor.u32 %v992_v24, %v989_v26  ;;  %v802_v46 = vld [vmem:[#allocation2 + $0x38] sm:$0x1] }
  0x80   : > { %v1024_v38 = vshrl.u32 %v6401_v29, 16  ;;  %v1030_v39 = vshll.u32 %v6405_v32, 16  ;;  %v1013_v41 = vrot.slane %v1011_v33, 4  ;;  %v1979_v44 = vrot.slane %v6405_v32, 5  ;;  %v5845_v63 = vld [vmem:[#allocation6 + $0x8] sm:$0xff]   ;;  %v5848_v33 = vld [vmem:[#allocation6 + $0x10] sm:$0xff]   ;;  %p6013_p3 = por %p6012_p13, %p6011_p10 }
  0x81   : > { %v1004_v37 = vrot.slane %v1003_v27, 4  ;;  %v1016_v42 = vrot.slane %v1014_v34, 5  ;;  %v1022_v43 = vrot.slane %v1020_v35, 5  ;;  %v994_v47 = vrot.slane %v993_v36, 4  ;;  %v337_v15 = vld [vmem:[#allocation2 + $0x44] sm:$0x1] }
  0x82   : > { %v1026_v49 = vrot.slane %v1024_v38, 4  ;;  %v1032_v50 = vrot.slane %v1030_v39, 5  ;;  %v288_v57 = vsel %vm6294_vm4, 0, %v287_v40  ;;  %v6423_v4 = vld [vmem:[#allocation2 + $0x24] sm:$0xf]  ;;  %v521_v10 = vsel %vm6320_vm10, %v513_v3, %v520_v53  ;;  %p6014_p7 = pnand %p6013_p3, %p6007_p8 }
  0x83   : > { %v1009_v48 = vsel %vm6314_vm9, %v1004_v37, %v1008_v31  ;;  %v1017_v51 = vor.u32 %v1016_v42, %v1013_v41  ;;  %v999_v59 = vsel %vm6314_vm9, %v994_v47, %v998_v16  ;;  %289 = vst [vmem:[#allocation2 + $0x3c] sm:$0x1] %v288_v57  ;;  %v803_v13 = vsel %vm6294_vm4, %v522_v56, %v802_v46  ;;  %v5844_v3 = vld [vmem:[#allocation6 + $0x148] sm:$0xff]   ;;  %v290_v26 = vld [vmem:[#allocation2 + $0x48] sm:$0x1]  ;;  %v227_v56 = vld [vmem:[%s6282_s9 + $0x58] sm:$0xff] }
  0x84   : > { %v6415_v52 = vld [vmem:[#allocation2 + $0x28] sm:$0xf]  ;;  %v1027_v61 = vor.u32 %v1026_v49, %v1022_v43  ;;  %v4494_v1 = vcombine.low %v999_v59, %v1009_v48  ;;  %v1035_v17 = vshrl.u32 %v6423_v4, 16  ;;  %v1038_v18 = vshll.u32 %v6423_v4, 16  ;;  %801 = vst [vmem:[#allocation2 + $0x34] sm:$0xf] %v521_v10 }
  0x85   : > { %v1044_v62 = vshll.u32 %v6415_v52, 16  ;;  %v1048_v0 = vshrl.u32 %v6415_v52, 16  ;;  %v1018_v2 = vrot.slane %v1017_v51, 4  ;;  %v6425_v8 = vld [vmem:[#allocation2 + $0x2c] sm:$0x1]  ;;  %v338_v41 = vsel %vm6302_vm8, 0, %v337_v15 }
  0x86   : > { %v1028_v16 = vrot.slane %v1027_v61, 4  ;;  %804 = vst [vmem:[#allocation2 + $0x38] sm:$0x1] %v803_v13  ;;  %v6435_v20 = vld [vmem:[#allocation2 + $0x30] sm:$0xf]  ;;  %5261 = vmatprep.mubr.bf16.mxu0 %v4494_v1  ;;  %5070 = vmatmul.mubr.bf16.vlgmr.msra.gmra.mrb[0].mxu1 %v4494_v1  ;;  %v1054_v22 = vshll.u32 %v6425_v8, 16 }
  0x87   : > { %v1046_v19 = vrot.slane %v1044_v62, 5  ;;  %v1023_v55 = vsel %vm6314_vm9, %v1018_v2, %v1022_v43  ;;  %v1050_v21 = vrot.slane %v1048_v0, 4  ;;  %v1059_v25 = vshrl.u32 %v6435_v20, 16  ;;  %5102 = vmatpush3.bf16.msra.mxu1 %v6338_v5  ;;  %v340_v34 = vld [vmem:[#allocation2 + $0x50] sm:$0x1]  ;;  %v226_v42 = vld [vmem:[%s6282_s9 + $0x50] sm:$0xff] }
  0x88   : > { %v1033_v24 = vsel %vm6314_vm9, %v1028_v16, %v1032_v50  ;;  %v1037_v27 = vrot.slane %v1035_v17, 4  ;;  %v1040_v30 = vrot.slane %v1038_v18, 5  ;;  %v1062_v31 = vshll.u32 %v6435_v20, 16  ;;  %5103 = vmatprep.subr.bf16.mxu1 %v5845_v63  ;;  %339 = vst [vmem:[#allocation2 + $0x44] sm:$0x1] %v338_v41  ;;  %v5846_v51 = vld [vmem:[#allocation6 + $0x150] sm:$0xff]  }
  0x89   : > { %v6445_v35 = vcombine.low %v1023_v55, %v1033_v24  ;;  %v1051_v36 = vor.u32 %v1050_v21, %v1046_v19  ;;  %v1056_v37 = vrot.slane %v1054_v22, 5  ;;  %v1061_v38 = vrot.slane %v1059_v25, 4  ;;  %v5851_v13 = vld [vmem:[#allocation6 + $0x18] sm:$0xff]   ;;  %v228_v24 = vld [vmem:[%s6282_s9 + $0x60] sm:$0xff]  ;;  %v229_v41 = vld [vmem:[%s6282_s9 + $0x68] sm:$0xff] }
  0x8a   : > { %v1041_v39 = vor.u32 %v1040_v30, %v1037_v27  ;;  %v1064_v40 = vrot.slane %v1062_v31, 5  ;;  %v524_v5 = vshrl.u32 %v6388_v11, 16  ;;  %v527_v46 = vshll.u32 %v6388_v11, 16  ;;  %v805_v10 = vld [vmem:[#allocation2 + $0x3c] sm:$0xf]  ;;  %v5847_v17 = vld [vmem:[#allocation6 + $0x158] sm:$0xff]  }
  0x8b   : > { %5262 = vmatmul.mubr.bf16.vlgmr.msra.gmra.mrb[0].mxu0 %v6445_v35  ;;  %5073 = vmatprep.mubr.bf16.mxu1 %v6445_v35  ;;  %v1052_v43 = vrot.slane %v1051_v36, 4  ;;  %v532_v47 = vshrl.u32 %v6390_v12, 16  ;;  %v535_v48 = vshll.u32 %v6390_v12, 16  ;;  %v291_v57 = vsel %vm6294_vm4, 0, %v290_v26  ;;  %v6462_v11 = vld [vmem:[#allocation2 + $0x34] sm:$0xf] }
  0x8c   : > { %5294 = vmatpush3.bf16.msra.mxu0 %v6344_v14  ;;  %v1042_v49 = vrot.slane %v1041_v39, 4  ;;  %v1065_v50 = vor.u32 %v1064_v40, %v1061_v38  ;;  %5104 = vmatpush3.bf16.msra.mxu1 %v5845_v63  ;;  %v526_v53 = vrot.slane %v524_v5, 7  ;;  %292 = vst [vmem:[#allocation2 + $0x48] sm:$0x1] %v291_v57  ;;  %v341_v14 = vsel %vm6302_vm8, 0, %v340_v34  ;;  %v230_v57 = vld [vmem:[%s6282_s9 + $0x70] sm:$0xff] }
  0x8d   : > { %5295 = vmatprep.subr.bf16.mxu0 %v5844_v3  ;;  %v1057_v59 = vsel %vm6314_vm9, %v1052_v43, %v1056_v37  ;;  %v6464_v61 = vld [vmem:[#allocation2 + $0x38] sm:$0x1]  ;;  %v534_v12 = vrot.slane %v532_v47, 7  ;;  %5105 = vmatprep.subr.bf16.mxu1 %v5848_v33  ;;  %v4687_v62 = vpack.c.bf16 %v226_v42, %v226_v42  ;;  %v1068_v2 = vshll.u32 %v6462_v11, 16  ;;  %342 = vst [vmem:[#allocation2 + $0x50] sm:$0x1] %v341_v14 }
  0x8e   : > { %v1047_v0 = vsel %vm6314_vm9, %v1042_v49, %v1046_v19  ;;  %v6470_v1 = vrot.slane %v1065_v50, 4  ;;  %v1072_v63 = vshrl.u32 %v6462_v11, 16  ;;  %v1078_v16 = vshll.u32 %v6464_v61, 16  ;;  %v293_v21 = vld [vmem:[#allocation2 + $0x54] sm:$0x1]  ;;  %v5849_v49 = vld [vmem:[#allocation6 + $0x160] sm:$0xff]  }
  0x8f   : > { %v6474_v15 = vcombine.low %v1047_v0, %v1057_v59  ;;  %v529_v18 = vor.u32 %v527_v46, %v526_v53  ;;  %v530_v55 = vrot.slane %v526_v53, 4  ;;  %v1070_v19 = vrot.slane %v1068_v2, 5  ;;  %v343_v27 = vld [vmem:[#allocation2 + $0x5c] sm:$0x1]  ;;  %v296_v37 = vld [vmem:[#allocation2 + $0x60] sm:$0x1] }
  0x90   : > { %5296 = vmatpush3.bf16.msra.mxu0 %v5844_v3  ;;  %v1074_v22 = vrot.slane %v1072_v63, 4  ;;  %v537_v25 = vor.u32 %v535_v48, %v534_v12  ;;  %v539_v26 = vrot.slane %v534_v12, 4  ;;  %5106 = vmatpush3.bf16.msra.mxu1 %v5848_v33  ;;  %v1080_v30 = vrot.slane %v1078_v16, 5  ;;  %v809_v39 = vld [vmem:[#allocation2 + $0x44] sm:$0x1]  ;;  %v5854_v16 = vld [vmem:[#allocation6 + $0x20] sm:$0xff]  }
  0x91   : > { %5265 = vmatprep.mubr.bf16.mxu0 %v6474_v15  ;;  %5074 = vmatmul.mubr.bf16.gmra.mrb[4].mxu1 %v6474_v15  ;;  %v806_v31 = vsel %vm6328_vm11, %v529_v18, %v805_v10  ;;  %v4688_v34 = vpack.c.bf16 %v227_v56, %v227_v56  ;;  %v541_v36 = vshrl.u32 %v4687_v62, 16  ;;  %v1071_v3 = vsel %vm6314_vm9, %v6470_v1, %v1070_v19  ;;  %v5925_v60 = vld [vmem:[#allocation2 + $0x30] sm:$0xf] }
  0x92   : > { %v1075_v38 = vor.u32 %v1074_v22, %v1070_v19  ;;  %5297 = vmatprep.subr.bf16.mxu0 %v5846_v51  ;;  %v538_v33 = vsel %vm6320_vm10, %v530_v55, %v537_v25  ;;  %807 = vst [vmem:[#allocation2 + $0x3c] sm:$0xf] %v806_v31  ;;  %v544_v40 = vshll.u32 %v4687_v62, 16  ;;  %5107 = vmatprep.subr.bf16.mxu1 %v5851_v13  ;;  %v294_v50 = vsel %vm6294_vm4, 0, %v293_v21  ;;  %v346_v62 = vld [vmem:[#allocation2 + $0x68] sm:$0x1] }
  0x93   : > { %808 = vst [vmem:[#allocation2 + $0x40] sm:$0xf] %v538_v33  ;;  %v810_v5 = vsel %vm6294_vm4, %v539_v26, %v809_v39  ;;  %v543_v42 = vrot.slane %v541_v36, 7  ;;  %v549_v43 = vshrl.u32 %v4688_v34, 16  ;;  %v552_v46 = vshll.u32 %v4688_v34, 16  ;;  %v231_v19 = vld [vmem:[%s6282_s9 + $0x78] sm:$0xff] }
  0x94   : > { %v1076_v47 = vrot.slane %v1075_v38, 4  ;;  %5298 = vmatpush3.bf16.msra.mxu0 %v5846_v51  ;;  %811 = vst [vmem:[#allocation2 + $0x44] sm:$0x1] %v810_v5  ;;  %v812_v48 = vld [vmem:[#allocation2 + $0x48] sm:$0xf]  ;;  %v344_v53 = vsel %vm6302_vm8, 0, %v343_v27  ;;  %v4689_v56 = vpack.c.bf16 %v228_v24, %v228_v24  ;;  %5108 = vmatpush3.bf16.msra.mxu1 %v5851_v13  ;;  %v4690_v51 = vpack.c.bf16 %v229_v41, %v229_v41 }
  0x95   : > { %5299 = vmatprep.subr.bf16.mxu0 %v5847_v17  ;;  %v546_v59 = vor.u32 %v544_v40, %v543_v42  ;;  %v547_v12 = vrot.slane %v543_v42, 4  ;;  %v551_v14 = vrot.slane %v549_v43, 7  ;;  %295 = vst [vmem:[#allocation2 + $0x54] sm:$0x1] %v294_v50  ;;  %345 = vst [vmem:[#allocation2 + $0x5c] sm:$0x1] %v344_v53  ;;  %5109 = vmatprep.subr.bf16.mxu1 %v5854_v16 }
  0x96   : > { %v1081_v0 = vsel %vm6314_vm9, %v1076_v47, %v1080_v30  ;;  %v816_v1 = vld [vmem:[#allocation2 + $0x50] sm:$0x1]  ;;  %v558_v2 = vshrl.u32 %v4689_v56, 16  ;;  %v561_v63 = vshll.u32 %v4689_v56, 16  ;;  %v297_v10 = vsel %vm6294_vm4, 0, %v296_v37  ;;  %v5850_v31 = vld [vmem:[#allocation6 + $0x168] sm:$0xff]  }
  0x97   : > { %v6499_v13 = vcombine.low %v1071_v3, %v1081_v0  ;;  %v554_v18 = vor.u32 %v552_v46, %v551_v14  ;;  %v556_v55 = vrot.slane %v551_v14, 4  ;;  %v813_v21 = vsel %vm6328_vm11, %v546_v59, %v812_v48  ;;  %298 = vst [vmem:[#allocation2 + $0x60] sm:$0x1] %v297_v10 }
  0x98   : > { %5300 = vmatpush3.bf16.msra.mxu0 %v5847_v17  ;;  %814 = vst [vmem:[#allocation2 + $0x48] sm:$0xf] %v813_v21  ;;  %v560_v22 = vrot.slane %v558_v2, 7  ;;  %v566_v25 = vshrl.u32 %v4690_v51, 16  ;;  %v569_v26 = vshll.u32 %v4690_v51, 16  ;;  %v347_v24 = vsel %vm6302_vm8, 0, %v346_v62  ;;  %5110 = vmatpush3.bf16.msra.mxu1 %v5854_v16 }
  0x99   : > { %5266 = vmatmul.mubr.bf16.gmra.mrb[4].mxu0 %v6499_v13  ;;  %5077 = vmatprep.mubr.bf16.mxu1 %v6499_v13  ;;  %v6508_v27 = vld [vmem:[#allocation2 + $0x3c] sm:$0xf]  ;;  %v555_v30 = vsel %vm6320_vm10, %v547_v12, %v554_v18  ;;  %v817_v17 = vsel %vm6294_vm4, %v556_v55, %v816_v1  ;;  %348 = vst [vmem:[#allocation2 + $0x68] sm:$0x1] %v347_v24  ;;  %v4542_v36 = vrot.slane %v6382_v6, 9  ;;  %v5852_v51 = vld [vmem:[#allocation6 + $0x170] sm:$0xff]  }
  0x9a   : > { %v4691_v34 = vpack.c.bf16 %v230_v57, %v230_v57  ;;  %v6515_v37 = vld [vmem:[#allocation2 + $0x40] sm:$0xf]  ;;  %v1083_v3 = vshrl.u32 %v6508_v27, 16  ;;  %v1086_v38 = vshll.u32 %v6508_v27, 16  ;;  %815 = vst [vmem:[#allocation2 + $0x4c] sm:$0xf] %v555_v30  ;;  %5301 = vmatprep.subr.bf16.mxu0 %v5849_v49  ;;  %v563_v33 = vor.u32 %v561_v63, %v560_v22 }
  0x9b   : > { %818 = vst [vmem:[#allocation2 + $0x50] sm:$0x1] %v817_v17  ;;  %v564_v39 = vrot.slane %v560_v22, 4  ;;  %v6519_v40 = vld [vmem:[#allocation2 + $0x44] sm:$0x1]  ;;  %v1092_v41 = vshll.u32 %v6515_v37, 16  ;;  %v6523_v43 = vpack.c.bf16 %v231_v19, %v231_v19 }
  0x9c   : > { %v1096_v5 = vshrl.u32 %v6515_v37, 16  ;;  %v568_v42 = vrot.slane %v566_v25, 7  ;;  %v1085_v46 = vrot.slane %v1083_v3, 4  ;;  %v1088_v47 = vrot.slane %v1086_v38, 5  ;;  %5302 = vmatpush3.bf16.msra.mxu0 %v5849_v49  ;;  %v819_v50 = vld [vmem:[#allocation2 + $0x54] sm:$0xf] }
  0x9d   : > { %v1102_v48 = vshll.u32 %v6519_v40, 16  ;;  %v575_v53 = vshrl.u32 %v4691_v34, 16  ;;  %v1094_v56 = vrot.slane %v1092_v41, 5  ;;  %5303 = vmatprep.subr.bf16.mxu0 %v5850_v31  ;;  %v823_v14 = vld [vmem:[#allocation2 + $0x5c] sm:$0x1]  ;;  %v820_v1 = vsel %vm6328_vm11, %v563_v33, %v819_v50  ;;  %v5856_v21 = vld [vmem:[#allocation6 + $0x28] sm:$0xff]  }
  0x9e   : > { %v1098_v57 = vrot.slane %v1096_v5, 4  ;;  %v571_v59 = vor.u32 %v569_v26, %v568_v42  ;;  %v573_v12 = vrot.slane %v568_v42, 4  ;;  %v1089_v62 = vor.u32 %v1088_v47, %v1085_v46  ;;  %v232_v49 = vld [vmem:[%s6282_s9 + $0x80] sm:$0xff]  ;;  %821 = vst [vmem:[#allocation2 + $0x54] sm:$0xf] %v820_v1  ;;  %v5853_v24 = vld [vmem:[#allocation6 + $0x178] sm:$0xff]   ;;  %5111 = vmatprep.subr.bf16.mxu1 %v5856_v21 }
  0x9f   : > { %v1104_v0 = vrot.slane %v1102_v48, 5  ;;  %v6528_v2 = vrot.slane %v575_v53, 7  ;;  %v6531_v10 = vld [vmem:[#allocation2 + $0x48] sm:$0xf]  ;;  %v578_v55 = vshll.u32 %v4691_v34, 16  ;;  %v583_v34 = vshrl.u32 %v6523_v43, 16  ;;  %5112 = vmatpush3.bf16.msra.mxu1 %v5856_v21 }
  0xa0   : > { %v1099_v63 = vor.u32 %v1098_v57, %v1094_v56  ;;  %v572_v16 = vsel %vm6320_vm10, %v564_v39, %v571_v59  ;;  %v824_v18 = vsel %vm6294_vm4, %v573_v12, %v823_v14  ;;  %v1090_v19 = vrot.slane %v1089_v62, 4  ;;  %5304 = vmatpush3.bf16.msra.mxu0 %v5850_v31  ;;  %v826_v42 = vld [vmem:[#allocation2 + $0x60] sm:$0xf]  ;;  %v830_v12 = vld [vmem:[#allocation2 + $0x68] sm:$0x1] }
  0xa1   : > { %v1107_v22 = vshrl.u32 %v6531_v10, 16  ;;  %v1110_v25 = vshll.u32 %v6531_v10, 16  ;;  %822 = vst [vmem:[#allocation2 + $0x58] sm:$0xf] %v572_v16  ;;  %825 = vst [vmem:[#allocation2 + $0x5c] sm:$0x1] %v824_v18  ;;  %v580_v38 = vor.u32 %v578_v55, %v6528_v2  ;;  %5305 = vmatprep.subr.bf16.mxu0 %v5852_v51  ;;  %v6546_v33 = vpack.c.bf16 %v232_v49, %v232_v49 }
  0xa2   : > { %v581_v26 = vrot.slane %v6528_v2, 4  ;;  %v1100_v30 = vrot.slane %v1099_v63, 4  ;;  %v6540_v17 = vld [vmem:[#allocation2 + $0x4c] sm:$0xf]  ;;  %v6542_v3 = vld [vmem:[#allocation2 + $0x50] sm:$0x1]  ;;  %v1095_v31 = vsel %vm6314_vm9, %v1090_v19, %v1094_v56 }
  0xa3   : > { %v1109_v39 = vrot.slane %v1107_v22, 4  ;;  %v1112_v41 = vrot.slane %v1110_v25, 5  ;;  %v1116_v5 = vshll.u32 %v6540_v17, 16  ;;  %v1120_v47 = vshrl.u32 %v6540_v17, 16  ;;  %v299_v18 = vld [vmem:[#allocation2 + $0x6c] sm:$0x1] }
  0xa4   : > { %v1105_v46 = vsel %vm6314_vm9, %v1100_v30, %v1104_v0  ;;  %v1126_v48 = vshll.u32 %v6542_v3, 16  ;;  %v585_v50 = vrot.slane %v583_v34, 7  ;;  %v586_v56 = vshll.u32 %v6523_v43, 16  ;;  %5306 = vmatpush3.bf16.msra.mxu0 %v5852_v51  ;;  %v6560_v0 = vld [vmem:[#allocation6 + $0x180] sm:$0xff]  }
  0xa5   : > { %v6555_v53 = vcombine.low %v1095_v31, %v1105_v46  ;;  %v1113_v57 = vor.u32 %v1112_v41, %v1109_v39  ;;  %v1118_v59 = vrot.slane %v1116_v5, 5  ;;  %v1122_v14 = vrot.slane %v1120_v47, 4  ;;  %5307 = vmatprep.subr.bf16.mxu0 %v5853_v24  ;;  %v6564_v63 = vld [vmem:[#allocation2 + $0x54] sm:$0xf]  ;;  %v233_v41 = vld [vmem:[%s6282_s9 + $0x88] sm:$0xff] }
  0xa6   : > { %v1128_v62 = vrot.slane %v1126_v48, 5  ;;  %v590_v1 = vrot.slane %v585_v50, 4  ;;  %v827_v2 = vsel %vm6328_vm11, %v580_v38, %v826_v42  ;;  %v588_v16 = vor.u32 %v586_v56, %v585_v50  ;;  %v5858_v48 = vld [vmem:[#allocation6 + $0x30] sm:$0xff]  }
  0xa7   : > { %5269 = vmatprep.mubr.bf16.mxu0 %v6555_v53  ;;  %5078 = vmatmul.mubr.bf16.gmra.mrb[8].mxu1 %v6555_v53  ;;  %v1114_v49 = vrot.slane %v1113_v57, 4  ;;  %828 = vst [vmem:[#allocation2 + $0x60] sm:$0xf] %v827_v2  ;;  %v1969_v43 = vrot.slane %v6374_v58, 5  ;;  %v1972_v51 = vrot.slane %v6384_v7, 5  ;;  %v1123_v55 = vor.u32 %v1122_v14, %v1118_v59 }
  0xa8   : > { %v6568_v21 = vld [vmem:[#allocation2 + $0x58] sm:$0xf]  ;;  %v6570_v19 = vld [vmem:[#allocation2 + $0x5c] sm:$0x1]  ;;  %v1131_v22 = vshrl.u32 %v6564_v63, 16  ;;  %v1134_v25 = vshll.u32 %v6564_v63, 16  ;;  %v831_v30 = vsel %vm6294_vm4, %v590_v1, %v830_v12  ;;  %5308 = vmatpush3.bf16.msra.mxu0 %v5853_v24  ;;  %v589_v47 = vsel %vm6320_vm10, %v581_v26, %v588_v16  ;;  %5113 = vmatprep.subr.bf16.mxu1 %v5858_v48 }
  0xa9   : > { %v349_v7 = vld [vmem:[#allocation2 + $0x74] sm:$0x1]  ;;  %v1119_v38 = vsel %vm6314_vm9, %v1114_v49, %v1118_v59  ;;  %v1140_v34 = vshll.u32 %v6568_v21, 16  ;;  %v1144_v31 = vshrl.u32 %v6568_v21, 16  ;;  %v1150_v39 = vshll.u32 %v6570_v19, 16  ;;  %5341 = vmatprep.subr.bf16.mxu0 %v6560_v0  ;;  %5114 = vmatpush3.bf16.msra.mxu1 %v5858_v48 }
  0xaa   : > { %832 = vst [vmem:[#allocation2 + $0x68] sm:$0x1] %v831_v30  ;;  %v1124_v5 = vrot.slane %v1123_v55, 4  ;;  %v1133_v42 = vrot.slane %v1131_v22, 4  ;;  %v1136_v46 = vrot.slane %v1134_v25, 5  ;;  %v1970_v56 = vsel %vm6578_vm14, %v4542_v36, %v1969_v43 }
  0xab   : > { %v1142_v50 = vrot.slane %v1140_v34, 5  ;;  %v1146_v57 = vrot.slane %v1144_v31, 4  ;;  %v1152_v59 = vrot.slane %v1150_v39, 5  ;;  %829 = vst [vmem:[#allocation2 + $0x64] sm:$0xf] %v589_v47  ;;  %v1971_v14 = vrot.slane %v1969_v43, 4 }
  0xac   : > { %v1129_v24 = vsel %vm6314_vm9, %v1124_v5, %v1128_v62  ;;  %v1137_v12 = vor.u32 %v1136_v46, %v1133_v42  ;;  %v300_v26 = vsel %vm6294_vm4, 0, %v299_v18  ;;  %v350_v49 = vsel %vm6302_vm8, 0, %v349_v7  ;;  %v5860_v42 = vld [vmem:[#allocation6 + $0x38] sm:$0xff]  }
  0xad   : > { %v6599_v1 = vcombine.low %v1119_v38, %v1129_v24  ;;  %v1147_v2 = vor.u32 %v1146_v57, %v1142_v50  ;;  %301 = vst [vmem:[#allocation2 + $0x6c] sm:$0x1] %v300_v26  ;;  %v4694_v6 = vpack.c.bf16 %v233_v41, %v233_v41  ;;  %v1973_v62 = vsel %vm6578_vm14, %v1971_v14, %v1972_v51 }
  0xae   : > { %v1138_v16 = vrot.slane %v1137_v12, 4  ;;  %v6603_v36 = vld [vmem:[#allocation2 + $0x60] sm:$0xf]  ;;  %351 = vst [vmem:[#allocation2 + $0x74] sm:$0x1] %v350_v49  ;;  %v592_v43 = vshrl.u32 %v6546_v33, 16  ;;  %v6613_v30 = vcombine.low %v1970_v56, %v1973_v62  ;;  %5115 = vmatprep.subr.bf16.mxu1 %v5860_v42 }
  0xaf   : > { %v595_v18 = vshll.u32 %v6546_v33, 16  ;;  %5270 = vmatmul.mubr.bf16.gmra.mrb[8].mxu0 %v6599_v1  ;;  %5081 = vmatprep.mubr.bf16.mxu1 %v6599_v1  ;;  %v1148_v55 = vrot.slane %v1147_v2, 4  ;;  %v1155_v22 = vshrl.u32 %v6603_v36, 16  ;;  %v1158_v25 = vshll.u32 %v6603_v36, 16  ;;  %v302_v56 = vld [vmem:[#allocation2 + $0x78] sm:$0x1] }
  0xb0   : > { %v1143_v7 = vsel %vm6314_vm9, %v1138_v16, %v1142_v50  ;;  %v594_v38 = vrot.slane %v592_v43, 7  ;;  %v600_v34 = vshrl.u32 %v4694_v6, 16  ;;  %v603_v31 = vshll.u32 %v4694_v6, 16  ;;  %v352_v2 = vld [vmem:[#allocation2 + $0x80] sm:$0x1]  ;;  %5116 = vmatpush3.bf16.msra.mxu1 %v5860_v42 }
  0xb1   : > { %v6617_v51 = vld [vmem:[#allocation2 + $0x68] sm:$0x1]  ;;  %v1153_v33 = vsel %vm6314_vm9, %v1148_v55, %v1152_v59  ;;  %v1157_v39 = vrot.slane %v1155_v22, 4  ;;  %v1160_v41 = vrot.slane %v1158_v25, 5  ;;  %v4543_v62 = vrot.slane %v6399_v28, 9 }
  0xb2   : > { %v1174_v5 = vshll.u32 %v6617_v51, 16  ;;  %v6622_v46 = vcombine.low %v1143_v7, %v1153_v33  ;;  %v6624_v47 = vld [vmem:[#allocation2 + $0x64] sm:$0xf]  ;;  %v597_v48 = vor.u32 %v595_v18, %v594_v38  ;;  %v598_v50 = vrot.slane %v594_v38, 4  ;;  %v234_v59 = vld [vmem:[%s6282_s9 + $0x90] sm:$0xff]  ;;  %v5864_v18 = vld [vmem:[#allocation6 + $0x80] sm:$0xff]  }
  0xb3   : > { %v602_v57 = vrot.slane %v600_v34, 7  ;;  %v1161_v24 = vor.u32 %v1160_v41, %v1157_v39  ;;  %v1164_v12 = vshll.u32 %v6624_v47, 16  ;;  %v1168_v14 = vshrl.u32 %v6624_v47, 16  ;;  %v235_v34 = vld [vmem:[%s6282_s9 + $0x98] sm:$0xff]  ;;  %v305_v39 = vld [vmem:[#allocation2 + $0x84] sm:$0x1]  ;;  %5149 = vmatprep.subr.bf16.mxu1 %v5864_v18 }
  0xb4   : > { %v1176_v26 = vrot.slane %v1174_v5, 5  ;;  %5273 = vmatprep.mubr.bf16.mxu0 %v6622_v46  ;;  %5082 = vmatmul.mubr.bf16.gmra.mrb[12].mxu1 %v6622_v46  ;;  %v833_v16 = vld [vmem:[#allocation2 + $0x6c] sm:$0xf]  ;;  %v1976_v43 = vrot.slane %v6401_v29, 5  ;;  %v303_v42 = vsel %vm6294_vm4, 0, %v302_v56  ;;  %v1983_v56 = vrot.slane %v6415_v52, 5 }
  0xb5   : > { %v605_v49 = vor.u32 %v603_v31, %v602_v57  ;;  %v607_v6 = vrot.slane %v602_v57, 4  ;;  %v1162_v55 = vrot.slane %v1161_v24, 4  ;;  %v1166_v22 = vrot.slane %v1164_v12, 5  ;;  %v837_v38 = vld [vmem:[#allocation2 + $0x74] sm:$0x1] }
  0xb6   : > { %v1170_v25 = vrot.slane %v1168_v14, 4  ;;  %v834_v7 = vsel %vm6328_vm11, %v597_v48, %v833_v16  ;;  %v1977_v28 = vsel %vm6578_vm14, %v4543_v62, %v1976_v43  ;;  %v1978_v29 = vrot.slane %v1976_v43, 4  ;;  %304 = vst [vmem:[#allocation2 + $0x78] sm:$0x1] %v303_v42  ;;  %v237_v62 = vld [vmem:[%s6282_s9 + $0xa8] sm:$0xff] }
  0xb7   : > { %v606_v33 = vsel %vm6320_vm10, %v598_v50, %v605_v49  ;;  %835 = vst [vmem:[#allocation2 + $0x6c] sm:$0xf] %v834_v7  ;;  %v838_v31 = vsel %vm6294_vm4, %v607_v6, %v837_v38  ;;  %v1167_v41 = vsel %vm6314_vm9, %v1162_v55, %v1166_v22  ;;  %v353_v48 = vsel %vm6302_vm8, 0, %v352_v2  ;;  %v355_v50 = vld [vmem:[#allocation2 + $0x8c] sm:$0x1]  ;;  %v236_v49 = vld [vmem:[%s6282_s9 + $0xa0] sm:$0xff] }
  0xb8   : > { %v1171_v5 = vor.u32 %v1170_v25, %v1166_v22  ;;  %836 = vst [vmem:[#allocation2 + $0x70] sm:$0xf] %v606_v33  ;;  %839 = vst [vmem:[#allocation2 + $0x74] sm:$0x1] %v838_v31  ;;  %v1980_v57 = vsel %vm6578_vm14, %v1978_v29, %v1979_v44  ;;  %v4695_v24 = vpack.c.bf16 %v234_v59, %v234_v59  ;;  %v4544_v14 = vrot.slane %v6423_v4, 9 }
  0xb9   : > { %354 = vst [vmem:[#allocation2 + $0x80] sm:$0x1] %v353_v48  ;;  %v4696_v12 = vpack.c.bf16 %v235_v34, %v235_v34  ;;  %v6654_v16 = vcombine.low %v1977_v28, %v1980_v57  ;;  %v1986_v2 = vrot.slane %v6425_v8, 5  ;;  %v1985_v4 = vrot.slane %v1983_v56, 4 }
  0xba   : > { %v1172_v6 = vrot.slane %v1171_v5, 4  ;;  %v609_v43 = vshrl.u32 %v4695_v24, 16  ;;  %v612_v32 = vshll.u32 %v4695_v24, 16  ;;  %v1984_v59 = vsel %vm6578_vm14, %v4544_v14, %v1983_v56 }
  0xbb   : > { %v617_v18 = vshrl.u32 %v4696_v12, 16  ;;  %v620_v55 = vshll.u32 %v4696_v12, 16  ;;  %v306_v22 = vsel %vm6294_vm4, 0, %v305_v39  ;;  %v356_v8 = vsel %vm6302_vm8, 0, %v355_v50 }
  0xbc   : > { %v1177_v44 = vsel %vm6314_vm9, %v1172_v6, %v1176_v26  ;;  %v611_v52 = vrot.slane %v609_v43, 7  ;;  %307 = vst [vmem:[#allocation2 + $0x84] sm:$0x1] %v306_v22  ;;  %v1987_v26 = vsel %vm6578_vm14, %v1985_v4, %v1986_v2  ;;  %357 = vst [vmem:[#allocation2 + $0x8c] sm:$0x1] %v356_v8  ;;  %v4697_v34 = vpack.c.bf16 %v236_v49, %v236_v49 }
  0xbd   : > { %v6665_v25 = vcombine.low %v1167_v41, %v1177_v44  ;;  %v619_v7 = vrot.slane %v617_v18, 7  ;;  %v4698_v33 = vpack.c.bf16 %v237_v62, %v237_v62  ;;  %v4545_v31 = vrot.slane %v6435_v20, 9  ;;  %v840_v24 = vld [vmem:[#allocation2 + $0x78] sm:$0xf]  ;;  %v308_v2 = vld [vmem:[#allocation2 + $0x90] sm:$0x1] }
  0xbe   : > { %v6669_v38 = vld [vmem:[#allocation2 + $0x6c] sm:$0xf]  ;;  %v614_v5 = vor.u32 %v612_v32, %v611_v52  ;;  %v615_v57 = vrot.slane %v611_v52, 4  ;;  %v358_v62 = vld [vmem:[#allocation2 + $0x98] sm:$0x1]  ;;  %v6692_v22 = vcombine.low %v1984_v59, %v1987_v26  ;;  %v626_v52 = vshrl.u32 %v4697_v34, 16 }
  0xbf   : > { %5274 = vmatmul.mubr.bf16.gmra.mrb[12].mxu0 %v6665_v25  ;;  %5085 = vmatprep.mubr.bf16.mxu1 %v6665_v25  ;;  %v6676_v28 = vld [vmem:[#allocation2 + $0x70] sm:$0xf]  ;;  %v6678_v29 = vld [vmem:[#allocation2 + $0x74] sm:$0x1]  ;;  %v1179_v39 = vshrl.u32 %v6669_v38, 16  ;;  %v1182_v41 = vshll.u32 %v6669_v38, 16  ;;  %v622_v42 = vor.u32 %v620_v55, %v619_v7 }
  0xc0   : > { %5309 = vmatprep.mubr.bf16.mxu0 %v6613_v30  ;;  %v1188_v48 = vshll.u32 %v6676_v28, 16  ;;  %v1192_v20 = vshrl.u32 %v6676_v28, 16  ;;  %v1198_v50 = vshll.u32 %v6678_v29, 16  ;;  %v624_v49 = vrot.slane %v619_v7, 4  ;;  %v844_v56 = vld [vmem:[#allocation2 + $0x80] sm:$0x1] }
  0xc1   : > { %v1181_v12 = vrot.slane %v1179_v39, 4  ;;  %v1184_v14 = vrot.slane %v1182_v41, 5  ;;  %v841_v6 = vsel %vm6328_vm11, %v614_v5, %v840_v24  ;;  %v623_v55 = vsel %vm6320_vm10, %v615_v57, %v622_v42  ;;  %v5857_v7 = vld [vmem:[#allocation6 + $0x188] sm:$0xff]  }
  0xc2   : > { %v1190_v43 = vrot.slane %v1188_v48, 5  ;;  %v1194_v32 = vrot.slane %v1192_v20, 4  ;;  %v1200_v18 = vrot.slane %v1198_v50, 5  ;;  %842 = vst [vmem:[#allocation2 + $0x78] sm:$0xf] %v841_v6  ;;  %v845_v4 = vsel %vm6294_vm4, %v624_v49, %v844_v56  ;;  %v238_v20 = vld [vmem:[%s6282_s9 + $0xb0] sm:$0xff] }
  0xc3   : > { %v1185_v44 = vor.u32 %v1184_v14, %v1181_v12  ;;  %843 = vst [vmem:[#allocation2 + $0x7c] sm:$0xf] %v623_v55  ;;  %846 = vst [vmem:[#allocation2 + $0x80] sm:$0x1] %v845_v4  ;;  %v629_v39 = vshll.u32 %v4697_v34, 16  ;;  %v634_v41 = vshrl.u32 %v4698_v33, 16 }
  0xc4   : > { %v1195_v8 = vor.u32 %v1194_v32, %v1190_v43  ;;  %v637_v5 = vshll.u32 %v4698_v33, 16  ;;  %v847_v48 = vld [vmem:[#allocation2 + $0x84] sm:$0xf]  ;;  %v239_v50 = vld [vmem:[%s6282_s9 + $0xb8] sm:$0xff]  ;;  %v628_v42 = vrot.slane %v626_v52, 7  ;;  %v1990_v12 = vrot.slane %v6462_v11, 5 }
  0xc5   : > { %v1186_v24 = vrot.slane %v1185_v44, 4  ;;  %v851_v57 = vld [vmem:[#allocation2 + $0x8c] sm:$0x1]  ;;  %v1993_v14 = vrot.slane %v6464_v61, 5  ;;  %v636_v59 = vrot.slane %v634_v41, 7  ;;  %v309_v26 = vsel %vm6294_vm4, 0, %v308_v2 }
  0xc6   : > { %v1196_v49 = vrot.slane %v1195_v8, 4  ;;  %v359_v34 = vsel %vm6302_vm8, 0, %v358_v62  ;;  %v631_v6 = vor.u32 %v629_v39, %v628_v42  ;;  %v632_v56 = vrot.slane %v628_v42, 4  ;;  %310 = vst [vmem:[#allocation2 + $0x90] sm:$0x1] %v309_v26  ;;  %v5859_v52 = vld [vmem:[#allocation6 + $0x190] sm:$0xff]  }
  0xc7   : > { %v1191_v33 = vsel %vm6314_vm9, %v1186_v24, %v1190_v43  ;;  %5310 = vmatmul.mubr.bf16.vlgmr.msra.gmra.mrb[0].mxu0 %v6654_v16  ;;  %v1991_v11 = vsel %vm6578_vm14, %v4545_v31, %v1990_v12  ;;  %360 = vst [vmem:[#allocation2 + $0x98] sm:$0x1] %v359_v34  ;;  %v639_v2 = vor.u32 %v637_v5, %v636_v59  ;;  %v641_v62 = vrot.slane %v636_v59, 4  ;;  %v361_v26 = vld [vmem:[#allocation2 + $0xa4] sm:$0x1]  ;;  %v5861_v34 = vld [vmem:[#allocation6 + $0x198] sm:$0xff]  }
  0xc8   : > { %v1201_v61 = vsel %vm6314_vm9, %v1196_v49, %v1200_v18  ;;  %5342 = vmatpush3.bf16.msra.mxu0 %v6560_v0  ;;  %5313 = vmatprep.mubr.bf16.mxu0 %v6692_v22  ;;  %v1992_v32 = vrot.slane %v1990_v12, 4  ;;  %v848_v44 = vsel %vm6328_vm11, %v631_v6, %v847_v48  ;;  %v4699_v31 = vpack.c.bf16 %v238_v20, %v238_v20 }
  0xc9   : > { %v6711_v43 = vcombine.low %v1191_v33, %v1201_v61  ;;  %v6713_v55 = vld [vmem:[#allocation2 + $0x78] sm:$0xf]  ;;  %5343 = vmatprep.subr.bf16.mxu0 %v5857_v7  ;;  %v4700_v4 = vpack.c.bf16 %v239_v50, %v239_v50  ;;  %v640_v39 = vsel %vm6320_vm10, %v632_v56, %v639_v2  ;;  %849 = vst [vmem:[#allocation2 + $0x84] sm:$0xf] %v848_v44 }
  0xca   : > { %v6717_v8 = vld [vmem:[#allocation2 + $0x7c] sm:$0xf]  ;;  %v1203_v0 = vshrl.u32 %v6713_v55, 16  ;;  %v1206_v18 = vshll.u32 %v6713_v55, 16  ;;  %v852_v41 = vsel %vm6294_vm4, %v641_v62, %v851_v57  ;;  %v6726_v5 = vld [vmem:[#allocation2 + $0x80] sm:$0x1]  ;;  %v1994_v50 = vsel %vm6578_vm14, %v1992_v32, %v1993_v14 }
  0xcb   : > { %7360 = vst [vmem:[#allocation15_spill] sm:$0xff] %v6711_v43  ;;  %5086 = vmatmul.mubr.bf16.gmra.mrb[16].mxu1 %v6711_v43  ;;  %v1212_v48 = vshll.u32 %v6717_v8, 16  ;;  %v1216_v20 = vshrl.u32 %v6717_v8, 16  ;;  %850 = vst [vmem:[#allocation2 + $0x88] sm:$0xf] %v640_v39  ;;  %v643_v24 = vshrl.u32 %v4699_v31, 16  ;;  %v6733_v59 = vcombine.low %v1991_v11, %v1994_v50 }
  0xcc   : > { %853 = vst [vmem:[#allocation2 + $0x8c] sm:$0x1] %v852_v41  ;;  %v1205_v42 = vrot.slane %v1203_v0, 4  ;;  %v1208_v12 = vrot.slane %v1206_v18, 5  ;;  %v1222_v49 = vshll.u32 %v6726_v5, 16  ;;  %5344 = vmatpush3.bf16.msra.mxu0 %v5857_v7  ;;  %v646_v61 = vshll.u32 %v4699_v31, 16 }
  0xcd   : > { %v311_v57 = vld [vmem:[#allocation2 + $0x9c] sm:$0x1]  ;;  %v1214_v33 = vrot.slane %v1212_v48, 5  ;;  %v1218_v6 = vrot.slane %v1216_v20, 4  ;;  %v645_v56 = vrot.slane %v643_v24, 7  ;;  %5345 = vmatprep.subr.bf16.mxu0 %v5859_v52  ;;  %v651_v44 = vshrl.u32 %v4700_v4, 16 }
  0xce   : > { %v1209_v2 = vor.u32 %v1208_v12, %v1205_v42  ;;  %v1224_v62 = vrot.slane %v1222_v49, 5  ;;  %v654_v14 = vshll.u32 %v4700_v4, 16  ;;  %v854_v32 = vld [vmem:[#allocation2 + $0x90] sm:$0xf]  ;;  %v4546_v7 = vrot.slane %v6508_v27, 9  ;;  %v240_v24 = vld [vmem:[%s6282_s9 + $0xc0] sm:$0xff] }
  0xcf   : > { %v1219_v0 = vor.u32 %v1218_v6, %v1214_v33  ;;  %5314 = vmatmul.mubr.bf16.gmra.mrb[4].mxu0 %v6733_v59  ;;  %v648_v11 = vor.u32 %v646_v61, %v645_v56  ;;  %v649_v18 = vrot.slane %v645_v56, 4  ;;  %v653_v41 = vrot.slane %v651_v44, 7  ;;  %v5865_v12 = vld [vmem:[#allocation6 + $0x1a0] sm:$0xff]  }
  0xd0   : > { %v1210_v39 = vrot.slane %v1209_v2, 4  ;;  %v1997_v48 = vrot.slane %v6515_v37, 5  ;;  %v2000_v31 = vrot.slane %v6519_v40, 5  ;;  %5346 = vmatpush3.bf16.msra.mxu0 %v5859_v52  ;;  %v6739_v50 = vld [vmem:[#allocation2 + $0x84] sm:$0xf]  ;;  %v312_v42 = vsel %vm6294_vm4, 0, %v311_v57 }
  0xd1   : > { %v1220_v20 = vrot.slane %v1219_v0, 4  ;;  %v855_v4 = vsel %vm6328_vm11, %v648_v11, %v854_v32  ;;  %v362_v27 = vsel %vm6302_vm8, 0, %v361_v26  ;;  %5347 = vmatprep.subr.bf16.mxu0 %v5861_v34  ;;  %v1227_v49 = vshrl.u32 %v6739_v50, 16  ;;  %v858_v61 = vld [vmem:[#allocation2 + $0x98] sm:$0x1]  ;;  %v241_v57 = vld [vmem:[%s6282_s9 + $0xc8] sm:$0xff] }
  0xd2   : > { %v1215_v37 = vsel %vm6314_vm9, %v1210_v39, %v1214_v33  ;;  %v6750_v40 = vld [vmem:[#allocation2 + $0x88] sm:$0xf]  ;;  %v1230_v6 = vshll.u32 %v6739_v50, 16  ;;  %v656_v56 = vor.u32 %v654_v14, %v653_v41  ;;  %856 = vst [vmem:[#allocation2 + $0x90] sm:$0xf] %v855_v4  ;;  %v5869_v32 = vld [vmem:[#allocation6 + $0x1a8] sm:$0xff]  }
  0xd3   : > { %v6752_v52 = vld [vmem:[#allocation2 + $0x8c] sm:$0x1]  ;;  %313 = vst [vmem:[#allocation2 + $0x9c] sm:$0x1] %v312_v42  ;;  %363 = vst [vmem:[#allocation2 + $0xa4] sm:$0x1] %v362_v27  ;;  %v1225_v26 = vsel %vm6314_vm9, %v1220_v20, %v1224_v62  ;;  %v1998_v20 = vsel %vm6578_vm14, %v4546_v7, %v1997_v48 }
  0xd4   : > { %v1236_v2 = vshll.u32 %v6750_v40, 16  ;;  %v1240_v33 = vshrl.u32 %v6750_v40, 16  ;;  %v1246_v44 = vshll.u32 %v6752_v52, 16  ;;  %v6762_v0 = vcombine.low %v1215_v37, %v1225_v26  ;;  %5348 = vmatpush3.bf16.msra.mxu0 %v5861_v34 }
  0xd5   : > { %v1229_v11 = vrot.slane %v1227_v49, 4  ;;  %v1232_v39 = vrot.slane %v1230_v6, 5  ;;  %v657_v14 = vsel %vm6320_vm10, %v649_v18, %v656_v56  ;;  %v658_v43 = vrot.slane %v653_v41, 4  ;;  %5349 = vmatprep.subr.bf16.mxu0 %v5865_v12 }
  0xd6   : > { %7361 = vst [vmem:[#allocation16_spill] sm:$0xff] %v6762_v0  ;;  %v1238_v4 = vrot.slane %v1236_v2, 5  ;;  %v1242_v42 = vrot.slane %v1240_v33, 4  ;;  %v1248_v27 = vrot.slane %v1246_v44, 5  ;;  %857 = vst [vmem:[#allocation2 + $0x94] sm:$0xf] %v657_v14  ;;  %5089 = vmatprep.mubr.bf16.mxu1 %v6762_v0  ;;  %v4701_v26 = vpack.c.bf16 %v240_v24, %v240_v24 }
  0xd7   : > { %v1233_v62 = vor.u32 %v1232_v39, %v1229_v11  ;;  %v1999_v37 = vrot.slane %v1997_v48, 4  ;;  %v859_v6 = vsel %vm6294_vm4, %v658_v43, %v858_v61  ;;  %v4702_v18 = vpack.c.bf16 %v241_v57, %v241_v57  ;;  %v5873_v43 = vld [vmem:[#allocation6 + $0x1b0] sm:$0xff]   ;;  %v243_v0 = vld [vmem:[%s6282_s9 + $0xd8] sm:$0xff] }
  0xd8   : > { %v1243_v49 = vor.u32 %v1242_v42, %v1238_v4  ;;  %v4547_v34 = vrot.slane %v6531_v10, 9  ;;  %860 = vst [vmem:[#allocation2 + $0x98] sm:$0x1] %v859_v6  ;;  %v660_v2 = vshrl.u32 %v4701_v26, 16  ;;  %v663_v33 = vshll.u32 %v4701_v26, 16  ;;  %5350 = vmatpush3.bf16.msra.mxu0 %v5865_v12 }
  0xd9   : > { %v1234_v56 = vrot.slane %v1233_v62, 4  ;;  %v2001_v41 = vsel %vm6578_vm14, %v1999_v37, %v2000_v31  ;;  %v6774_v11 = vld [vmem:[#allocation2 + $0x90] sm:$0xf]  ;;  %v668_v48 = vshrl.u32 %v4702_v18, 16  ;;  %v671_v24 = vshll.u32 %v4702_v18, 16  ;;  %5351 = vmatprep.subr.bf16.mxu0 %v5869_v32 }
  0xda   : > { %v1244_v44 = vrot.slane %v1243_v49, 4  ;;  %v6776_v7 = vcombine.low %v1998_v20, %v2001_v41  ;;  %v1251_v61 = vshrl.u32 %v6774_v11, 16  ;;  %v1254_v57 = vshll.u32 %v6774_v11, 16  ;;  %v861_v39 = vld [vmem:[#allocation2 + $0x9c] sm:$0xf] }
  0xdb   : > { %v1239_v10 = vsel %vm6314_vm9, %v1234_v56, %v1238_v4  ;;  %v662_v31 = vrot.slane %v660_v2, 7  ;;  %v670_v14 = vrot.slane %v668_v48, 7  ;;  %v865_v42 = vld [vmem:[#allocation2 + $0xa4] sm:$0x1]  ;;  %v2004_v62 = vrot.slane %v6540_v17, 5 }
  0xdc   : > { %v1249_v12 = vsel %vm6314_vm9, %v1244_v44, %v1248_v27  ;;  %5317 = vmatprep.mubr.bf16.mxu0 %v6776_v7  ;;  %v2007_v20 = vrot.slane %v6542_v3, 5  ;;  %v314_v37 = vld [vmem:[#allocation2 + $0xa8] sm:$0x1]  ;;  %v1253_v49 = vrot.slane %v1251_v61, 4  ;;  %v1256_v6 = vrot.slane %v1254_v57, 5  ;;  %5352 = vmatpush3.bf16.msra.mxu0 %v5869_v32  ;;  %v5877_v3 = vld [vmem:[#allocation6 + $0x1b8] sm:$0xff]  }
  0xdd   : > { %v6787_v26 = vcombine.low %v1239_v10, %v1249_v12  ;;  %v6789_v4 = vld [vmem:[#allocation2 + $0x94] sm:$0xf]  ;;  %v665_v18 = vor.u32 %v663_v33, %v662_v31  ;;  %v364_v56 = vld [vmem:[#allocation2 + $0xb0] sm:$0x1]  ;;  %v666_v2 = vrot.slane %v662_v31, 4  ;;  %v673_v17 = vor.u32 %v671_v24, %v670_v14  ;;  %5353 = vmatprep.subr.bf16.mxu0 %v5873_v43  ;;  %v242_v32 = vld [vmem:[%s6282_s9 + $0xd0] sm:$0xff] }
  0xde   : > { %v1260_v27 = vshll.u32 %v6789_v4, 16  ;;  %v1264_v41 = vshrl.u32 %v6789_v4, 16  ;;  %v1257_v44 = vor.u32 %v1256_v6, %v1253_v49  ;;  %v675_v48 = vrot.slane %v670_v14, 4  ;;  %v317_v49 = vld [vmem:[#allocation2 + $0xb4] sm:$0x1] }
  0xdf   : > { %7362 = vst [vmem:[#allocation17_spill] sm:$0xff] %v6787_v26  ;;  %5090 = vmatmul.mubr.bf16.gmra.mrb[20].mxu1 %v6787_v26  ;;  %v862_v10 = vsel %vm6328_vm11, %v665_v18, %v861_v39  ;;  %v2005_v33 = vsel %vm6578_vm14, %v4547_v34, %v2004_v62  ;;  %v6799_v61 = vld [vmem:[#allocation2 + $0x98] sm:$0x1]  ;;  %v674_v24 = vsel %vm6320_vm10, %v666_v2, %v673_v17  ;;  %v2006_v31 = vrot.slane %v2004_v62, 4  ;;  %v367_v6 = vld [vmem:[#allocation2 + $0xbc] sm:$0x1] }
  0xe0   : > { %v1262_v57 = vrot.slane %v1260_v27, 5  ;;  %v1266_v12 = vrot.slane %v1264_v41, 4  ;;  %863 = vst [vmem:[#allocation2 + $0x9c] sm:$0xf] %v862_v10  ;;  %v1258_v26 = vrot.slane %v1257_v44, 4  ;;  %v1270_v14 = vshll.u32 %v6799_v61, 16  ;;  %5354 = vmatpush3.bf16.msra.mxu0 %v5873_v43 }
  0xe1   : > { %864 = vst [vmem:[#allocation2 + $0xa0] sm:$0xf] %v674_v24  ;;  %v866_v39 = vsel %vm6294_vm4, %v675_v48, %v865_v42  ;;  %v315_v34 = vsel %vm6294_vm4, 0, %v314_v37  ;;  %v2008_v27 = vsel %vm6578_vm14, %v2006_v31, %v2007_v20  ;;  %v365_v62 = vsel %vm6302_vm8, 0, %v364_v56  ;;  %5355 = vmatprep.subr.bf16.mxu0 %v5877_v3  ;;  %v6817_v43 = vld [vmem:[#allocation6 + $0x1c0] sm:$0xff]  }
  0xe2   : > { %v1267_v18 = vor.u32 %v1266_v12, %v1262_v57  ;;  %867 = vst [vmem:[#allocation2 + $0xa4] sm:$0x1] %v866_v39  ;;  %316 = vst [vmem:[#allocation2 + $0xa8] sm:$0x1] %v315_v34  ;;  %v4703_v41 = vpack.c.bf16 %v242_v32, %v242_v32  ;;  %v1263_v42 = vsel %vm6314_vm9, %v1258_v26, %v1262_v57  ;;  %v1272_v2 = vrot.slane %v1270_v14, 5 }
  0xe3   : > { %v6815_v17 = vcombine.low %v2005_v33, %v2008_v27  ;;  %366 = vst [vmem:[#allocation2 + $0xb0] sm:$0x1] %v365_v62  ;;  %v4704_v37 = vpack.c.bf16 %v243_v0, %v243_v0  ;;  %v4548_v20 = vrot.slane %v6564_v63, 9  ;;  %v2011_v12 = vrot.slane %v6568_v21, 5 }
  0xe4   : > { %v1268_v44 = vrot.slane %v1267_v18, 4  ;;  %v677_v48 = vshrl.u32 %v4703_v41, 16  ;;  %v680_v10 = vshll.u32 %v4703_v41, 16  ;;  %v2014_v26 = vrot.slane %v6570_v19, 5  ;;  %5356 = vmatpush3.bf16.msra.mxu0 %v5877_v3 }
  0xe5   : > { %5318 = vmatmul.mubr.bf16.gmra.mrb[8].mxu0 %v6815_v17  ;;  %v685_v56 = vshrl.u32 %v4704_v37, 16  ;;  %v688_v32 = vshll.u32 %v4704_v37, 16  ;;  %v318_v0 = vsel %vm6294_vm4, 0, %v317_v49  ;;  %v368_v24 = vsel %vm6302_vm8, 0, %v367_v6  ;;  %5389 = vmatprep.subr.bf16.mxu0 %v6817_v43 }
  0xe6   : > { %v1273_v33 = vsel %vm6314_vm9, %v1268_v44, %v1272_v2  ;;  %v679_v57 = vrot.slane %v677_v48, 7  ;;  %v2012_v21 = vsel %vm6578_vm14, %v4548_v20, %v2011_v12  ;;  %v2013_v19 = vrot.slane %v2011_v12, 4  ;;  %319 = vst [vmem:[#allocation2 + $0xb4] sm:$0x1] %v318_v0  ;;  %369 = vst [vmem:[#allocation2 + $0xbc] sm:$0x1] %v368_v24 }
  0xe7   : > { %v6829_v63 = vcombine.low %v1263_v42, %v1273_v33  ;;  %v6831_v31 = vld [vmem:[#allocation2 + $0x9c] sm:$0xf]  ;;  %v687_v14 = vrot.slane %v685_v56, 7  ;;  %v245_v56 = vld [vmem:[%s6282_s9 + $0xe8] sm:$0xff] }
  0xe8   : > { %v6836_v39 = vld [vmem:[#allocation2 + $0xa0] sm:$0xf]  ;;  %v1275_v34 = vshrl.u32 %v6831_v31, 16  ;;  %v1278_v3 = vshll.u32 %v6831_v31, 16  ;;  %v682_v49 = vor.u32 %v680_v10, %v679_v57  ;;  %v683_v6 = vrot.slane %v679_v57, 4  ;;  %v244_v2 = vld [vmem:[%s6282_s9 + $0xe0] sm:$0xff] }
  0xe9   : > { %7363 = vst [vmem:[#allocation18_spill] sm:$0xff] %v6829_v63  ;;  %5093 = vmatprep.mubr.bf16.mxu1 %v6829_v63  ;;  %v6841_v18 = vld [vmem:[#allocation2 + $0xa4] sm:$0x1]  ;;  %v1284_v27 = vshll.u32 %v6836_v39, 16  ;;  %v1288_v62 = vshrl.u32 %v6836_v39, 16  ;;  %v690_v41 = vor.u32 %v688_v32, %v687_v14  ;;  %v692_v42 = vrot.slane %v687_v14, 4 }
  0xea   : > { %v1277_v37 = vrot.slane %v1275_v34, 4  ;;  %v1280_v44 = vrot.slane %v1278_v3, 5  ;;  %v1294_v48 = vshll.u32 %v6841_v18, 16  ;;  %v868_v20 = vld [vmem:[#allocation2 + $0xa8] sm:$0xf]  ;;  %v2015_v10 = vsel %vm6578_vm14, %v2013_v19, %v2014_v26 }
  0xeb   : > { %v1286_v12 = vrot.slane %v1284_v27, 5  ;;  %v1290_v33 = vrot.slane %v1288_v62, 4  ;;  %v691_v57 = vsel %vm6320_vm10, %v683_v6, %v690_v41  ;;  %v869_v0 = vsel %vm6328_vm11, %v682_v49, %v868_v20  ;;  %v872_v32 = vld [vmem:[#allocation2 + $0xb0] sm:$0x1] }
  0xec   : > { %v1281_v24 = vor.u32 %v1280_v44, %v1277_v37  ;;  %v1296_v14 = vrot.slane %v1294_v48, 5  ;;  %870 = vst [vmem:[#allocation2 + $0xa8] sm:$0xf] %v869_v0  ;;  %871 = vst [vmem:[#allocation2 + $0xac] sm:$0xf] %v691_v57  ;;  %v873_v34 = vsel %vm6294_vm4, %v692_v42, %v872_v32  ;;  %v6856_v3 = vcombine.low %v2012_v21, %v2015_v10 }
  0xed   : > { %v1291_v26 = vor.u32 %v1290_v33, %v1286_v12  ;;  %874 = vst [vmem:[#allocation2 + $0xb0] sm:$0x1] %v873_v34  ;;  %v4705_v19 = vpack.c.bf16 %v244_v2, %v244_v2  ;;  %v4706_v27 = vpack.c.bf16 %v245_v56, %v245_v56  ;;  %v4549_v62 = vrot.slane %v6603_v36, 9  ;;  %v875_v20 = vld [vmem:[#allocation2 + $0xb4] sm:$0xf] }
  0xee   : > { %v1282_v6 = vrot.slane %v1281_v24, 4  ;;  %5321 = vmatprep.mubr.bf16.mxu0 %v6856_v3  ;;  %v2018_v49 = vrot.slane %v6624_v47, 5  ;;  %v879_v10 = vld [vmem:[#allocation2 + $0xbc] sm:$0x1]  ;;  %v2021_v47 = vrot.slane %v6617_v51, 5  ;;  %v4550_v32 = vrot.slane %v6669_v38, 9 }
  0xef   : > { %v1292_v41 = vrot.slane %v1291_v26, 4  ;;  %v694_v37 = vshrl.u32 %v4705_v19, 16  ;;  %v697_v44 = vshll.u32 %v4705_v19, 16  ;;  %v702_v48 = vshrl.u32 %v4706_v27, 16 }
  0xf0   : > { %v1287_v42 = vsel %vm6314_vm9, %v1282_v6, %v1286_v12  ;;  %v705_v21 = vshll.u32 %v4706_v27, 16  ;;  %v2019_v2 = vsel %vm6578_vm14, %v4549_v62, %v2018_v49  ;;  %v2020_v56 = vrot.slane %v2018_v49, 4 }
  0xf1   : > { %v1297_v36 = vsel %vm6314_vm9, %v1292_v41, %v1296_v14  ;;  %v696_v33 = vrot.slane %v694_v37, 7  ;;  %v704_v57 = vrot.slane %v702_v48, 7  ;;  %v2025_v12 = vrot.slane %v6676_v28, 5 }
  0xf2   : > { %v6868_v0 = vcombine.low %v1287_v42, %v1297_v36  ;;  %v2028_v24 = vrot.slane %v6678_v29, 5 }
  0xf3   : > { %v6873_v34 = vld [vmem:[#allocation2 + $0xa8] sm:$0xf]  ;;  %v6875_v26 = vld [vmem:[#allocation2 + $0xac] sm:$0xf]  ;;  %v699_v19 = vor.u32 %v697_v44, %v696_v33  ;;  %v700_v27 = vrot.slane %v696_v33, 4  ;;  %v707_v62 = vor.u32 %v705_v21, %v704_v57  ;;  %v709_v14 = vrot.slane %v704_v57, 4 }
  0xf4   : > { %7364 = vst [vmem:[#allocation19_spill] sm:$0xff] %v6868_v0  ;;  %5094 = vmatmul.mubr.bf16.gmra.mrb[24].mxu1 %v6868_v0  ;;  %v6878_v6 = vld [vmem:[#allocation2 + $0xb0] sm:$0x1]  ;;  %v1299_v51 = vshrl.u32 %v6873_v34, 16  ;;  %v1302_v38 = vshll.u32 %v6873_v34, 16  ;;  %v1308_v28 = vshll.u32 %v6875_v26, 16  ;;  %v2022_v57 = vsel %vm6578_vm14, %v2020_v56, %v2021_v47 }
  0xf5   : > { %v1312_v29 = vshrl.u32 %v6875_v26, 16  ;;  %v1318_v49 = vshll.u32 %v6878_v6, 16  ;;  %v708_v41 = vsel %vm6320_vm10, %v700_v27, %v707_v62  ;;  %v876_v37 = vsel %vm6328_vm11, %v699_v19, %v875_v20 }
  0xf6   : > { %v880_v44 = vsel %vm6294_vm4, %v709_v14, %v879_v10  ;;  %v1301_v48 = vrot.slane %v1299_v51, 4  ;;  %v1304_v42 = vrot.slane %v1302_v38, 5  ;;  %v1310_v21 = vrot.slane %v1308_v28, 5  ;;  %877 = vst [vmem:[#allocation2 + $0xb4] sm:$0xf] %v876_v37 }
  0xf7   : > { %v1314_v36 = vrot.slane %v1312_v29, 4  ;;  %878 = vst [vmem:[#allocation2 + $0xb8] sm:$0xf] %v708_v41  ;;  %881 = vst [vmem:[#allocation2 + $0xbc] sm:$0x1] %v880_v44  ;;  %v1320_v33 = vrot.slane %v1318_v49, 5  ;;  %v2026_v27 = vsel %vm6578_vm14, %v4550_v32, %v2025_v12  ;;  %v6895_v19 = vcombine.low %v2019_v2, %v2022_v57 }
  0xf8   : > { %v2027_v62 = vrot.slane %v2025_v12, 4  ;;  %v1305_v0 = vor.u32 %v1304_v42, %v1301_v48  ;;  %v4551_v10 = vrot.slane %v6713_v55, 9  ;;  %v2032_v51 = vrot.slane %v6717_v8, 5 }
  0xf9   : > { %v1315_v20 = vor.u32 %v1314_v36, %v1310_v21  ;;  %v2035_v38 = vrot.slane %v6726_v5, 5  ;;  %5322 = vmatmul.mubr.bf16.gmra.mrb[12].mxu0 %v6895_v19  ;;  %v4552_v47 = vrot.slane %v6739_v50, 9  ;;  %v2039_v12 = vrot.slane %v6750_v40, 5 }
  0xfa   : > { %v2029_v14 = vsel %vm6578_vm14, %v2027_v62, %v2028_v24  ;;  %v1306_v28 = vrot.slane %v1305_v0, 4  ;;  %v2033_v2 = vsel %vm6578_vm14, %v4551_v10, %v2032_v51  ;;  %v2034_v32 = vrot.slane %v2032_v51, 4 }
  0xfb   : > { %v1316_v29 = vrot.slane %v1315_v20, 4  ;;  %v6903_v56 = vcombine.low %v2026_v27, %v2029_v14  ;;  %v2042_v0 = vrot.slane %v6752_v52, 5  ;;  %v4553_v49 = vrot.slane %v6774_v11, 9 }
  0xfc   : > { %v1311_v24 = vsel %vm6314_vm9, %v1306_v28, %v1310_v21  ;;  %v2036_v42 = vsel %vm6578_vm14, %v2034_v32, %v2035_v38  ;;  %v2040_v21 = vsel %vm6578_vm14, %v4552_v47, %v2039_v12  ;;  %v2041_v20 = vrot.slane %v2039_v12, 4 }
  0xfd   : > { %v1321_v5 = vsel %vm6314_vm9, %v1316_v29, %v1320_v33  ;;  %5325 = vmatprep.mubr.bf16.mxu0 %v6903_v56  ;;  %v6918_v37 = vld [vmem:[#allocation2 + $0xb4] sm:$0xf]  ;;  %v6934_v62 = vcombine.low %v2033_v2, %v2036_v42  ;;  %v2046_v10 = vrot.slane %v6789_v4, 5  ;;  %v2049_v2 = vrot.slane %v6799_v61, 5  ;;  %v6951_v61 = vld [vmem:[#allocation2] sm:$0xf] }
  0xfe   : > { %v6916_v41 = vcombine.low %v1311_v24, %v1321_v5  ;;  %v6920_v44 = vld [vmem:[#allocation2 + $0xb8] sm:$0xf]  ;;  %v6922_v48 = vld [vmem:[#allocation2 + $0xbc] sm:$0x1]  ;;  %v1323_v36 = vshrl.u32 %v6918_v37, 16  ;;  %v1326_v52 = vshll.u32 %v6918_v37, 16  ;;  %v2043_v47 = vsel %vm6578_vm14, %v2041_v20, %v2042_v0 }
  0xff   : > { %v1332_v33 = vshll.u32 %v6920_v44, 16  ;;  %v1336_v57 = vshrl.u32 %v6920_v44, 16  ;;  %v1342_v27 = vshll.u32 %v6922_v48, 16  ;;  %v2048_v32 = vrot.slane %v2046_v10, 4  ;;  %v6953_v20 = vld [vmem:[#allocation2 + $0x4] sm:$0xf] }
 0x100   : > { %7365 = vst [vmem:[#allocation20_spill] sm:$0xff] %v6916_v41  ;;  %5097 = vmatprep.mubr.bf16.mxu1 %v6916_v41  ;;  %v1325_v14 = vrot.slane %v1323_v36, 4  ;;  %v1328_v51 = vrot.slane %v1326_v52, 5  ;;  %v6940_v41 = vcombine.low %v2040_v21, %v2043_v47  ;;  %v2047_v12 = vsel %vm6578_vm14, %v4553_v49, %v2046_v10  ;;  %v320_v21 = vld [vmem:[#allocation2 + $0xc0] sm:$0x1] }
 0x101   : > { %v1334_v38 = vrot.slane %v1332_v33, 5  ;;  %v1338_v28 = vrot.slane %v1336_v57, 4  ;;  %v1344_v29 = vrot.slane %v1342_v27, 5  ;;  %5326 = vmatmul.mubr.bf16.gmra.mrb[16].mxu0 %v6934_v62  ;;  %v4554_v42 = vrot.slane %v6831_v31, 9  ;;  %v370_v27 = vld [vmem:[#allocation2 + $0xc8] sm:$0x1] }
 0x102   : > { %v1329_v24 = vor.u32 %v1328_v51, %v1325_v14  ;;  %v2053_v36 = vrot.slane %v6836_v39, 5  ;;  %v2056_v52 = vrot.slane %v6841_v18, 5  ;;  %5329 = vmatprep.mubr.bf16.mxu0 %v6940_v41  ;;  %v2050_v57 = vsel %vm6578_vm14, %v2048_v32, %v2049_v2 }
 0x103   : > { %v1339_v5 = vor.u32 %v1338_v28, %v1334_v38  ;;  %v4517_v49 = vcombine.low %v6951_v61, %v6953_v20  ;;  %v2060_v14 = vrot.slane %v6875_v26, 5  ;;  %v6964_v47 = vcombine.low %v2047_v12, %v2050_v57  ;;  %v5919_v57 = vld [vmem:[#allocation2 + $0xc] sm:$0xf] }
 0x104   : > { %v1330_v33 = vrot.slane %v1329_v24, 4  ;;  %v2054_v18 = vsel %vm6578_vm14, %v4554_v42, %v2053_v36  ;;  %v2055_v10 = vrot.slane %v2053_v36, 4  ;;  %v4555_v32 = vrot.slane %v6873_v34, 9  ;;  %v246_v36 = vld [vmem:[%s6282_s9 + $0xf0] sm:$0xff] }
 0x105   : > { %v1340_v0 = vrot.slane %v1339_v5, 4  ;;  %v2062_v2 = vrot.slane %v2060_v14, 4  ;;  %v2063_v42 = vrot.slane %v6878_v6, 5  ;;  %v2070_v12 = vrot.slane %v6922_v48, 5  ;;  %v5918_v6 = vld [vmem:[#allocation2 + $0x10] sm:$0xf] }
 0x106   : > { %v1335_v51 = vsel %vm6314_vm9, %v1330_v33, %v1334_v38  ;;  %v2057_v5 = vsel %vm6578_vm14, %v2055_v10, %v2056_v52  ;;  %v4556_v38 = vrot.slane %v6918_v37, 9  ;;  %v2067_v33 = vrot.slane %v6920_v44, 5  ;;  %v5920_v10 = vld [vmem:[#allocation2 + $0x18] sm:$0xf] }
 0x107   : > { %v1345_v28 = vsel %vm6314_vm9, %v1340_v0, %v1344_v29  ;;  %v6973_v63 = vcombine.low %v2054_v18, %v2057_v5  ;;  %v247_v29 = vld [vmem:[%s6282_s9 + $0xf8] sm:$0xff]  ;;  %v321_v0 = vsel %vm6294_vm4, 0, %v320_v21  ;;  %v371_v52 = vsel %vm6302_vm8, 0, %v370_v27 }
 0x108   : > { %v6967_v24 = vcombine.low %v1335_v51, %v1345_v28  ;;  %v6984_v18 = vcombine.low %v5919_v57, %v5918_v6  ;;  %v5921_v51 = vld [vmem:[#allocation2 + $0x1c] sm:$0xf]  ;;  %v2069_v5 = vrot.slane %v2067_v33, 4  ;;  %322 = vst [vmem:[#allocation2 + $0xc0] sm:$0x1] %v321_v0  ;;  %v4707_v48 = vpack.c.bf16 %v246_v36, %v246_v36 }
 0x109   : > { %v6986_v28 = vcombine.low %v5920_v10, %v5921_v51  ;;  %5330 = vmatmul.mubr.bf16.gmra.mrb[20].mxu0 %v6964_v47  ;;  %372 = vst [vmem:[#allocation2 + $0xc8] sm:$0x1] %v371_v52  ;;  %v2061_v23 = vsel %vm6578_vm14, %v4555_v32, %v2060_v14  ;;  %v2064_v21 = vsel %vm6578_vm14, %v2062_v2, %v2063_v42 }
 0x10a   : > { %5098 = vmatmul.mubr.bf16.gmra.mrb[28].mxu1 %v6967_v24  ;;  %5333 = vmatprep.mubr.bf16.mxu0 %v6973_v63  ;;  %v4708_v27 = vpack.c.bf16 %v247_v29, %v247_v29  ;;  %v2068_v6 = vsel %vm6578_vm14, %v4556_v38, %v2067_v33  ;;  %v711_v57 = vshrl.u32 %v4707_v48, 16  ;;  %v714_v0 = vshll.u32 %v4707_v48, 16  ;;  %v5924_v48 = vld [vmem:[#allocation2 + $0x24] sm:$0xf] }
 0x10b   : > { %5117 = vmatprep.mubr.bf16.mxu1 %v4517_v49  ;;  %v6996_v49 = vcombine.low %v6713_v55, %v6717_v8  ;;  %v7002_v36 = vcombine.low %v6739_v50, %v6750_v40  ;;  %v2071_v14 = vsel %vm6578_vm14, %v2069_v5, %v2070_v12  ;;  %v7008_v2 = vcombine.low %v6774_v11, %v6789_v4  ;;  %v5868_v40 = vld [vmem:[#allocation6 + $0x88] sm:$0xff]   ;;  %v5923_v5 = vld [vmem:[#allocation2 + $0x28] sm:$0xf] }
 0x10c   : > { %v719_v32 = vshrl.u32 %v4708_v27, 16  ;;  %v722_v52 = vshll.u32 %v4708_v27, 16  ;;  %v713_v55 = vrot.slane %v711_v57, 7  ;;  %v7012_v8 = vcombine.low %v6831_v31, %v6836_v39 }
 0x10d   : > { %v7016_v42 = vcombine.low %v6873_v34, %v6875_v26  ;;  %v7020_v50 = vcombine.low %v6918_v37, %v6920_v44  ;;  %v7022_v38 = vcombine.low %v2061_v23, %v2064_v21  ;;  %v7024_v29 = vcombine.low %v2068_v6, %v2071_v14  ;;  %v5922_v34 = vld [vmem:[#allocation6 + $0x80] sm:$0xff]   ;;  %v5872_v37 = vld [vmem:[#allocation6 + $0x90] sm:$0xff]   ;;  %v5926_v21 = vld [vmem:[#allocation2 + $0x34] sm:$0xf] }
 0x10e   : > { %v721_v33 = vrot.slane %v719_v32, 7  ;;  %v716_v11 = vor.u32 %v714_v0, %v713_v55  ;;  %v717_v4 = vrot.slane %v713_v55, 4  ;;  %v7036_v23 = vcombine.low %v5924_v48, %v5923_v5  ;;  %v5880_v14 = vld [vmem:[#allocation6 + $0xa0] sm:$0xff]  }
 0x10f   : > { %v882_v12 = vld [vmem:[#allocation2 + $0xc0] sm:$0xf]  ;;  %v7038_v27 = vcombine.low %v5925_v60, %v5926_v21  ;;  %v5927_v32 = vld [vmem:[#allocation2 + $0x3c] sm:$0xf] }
 0x110   : > { %v724_v31 = vor.u32 %v722_v52, %v721_v33  ;;  %v726_v39 = vrot.slane %v721_v33, 4  ;;  %v886_v10 = vld [vmem:[#allocation2 + $0xc8] sm:$0x1]  ;;  %v883_v26 = vsel %vm6328_vm11, %v716_v11, %v882_v12  ;;  %v5928_v52 = vld [vmem:[#allocation2 + $0x40] sm:$0xf] }
 0x111   : > { %5334 = vmatmul.mubr.bf16.gmra.mrb[24].mxu0 %v7022_v38  ;;  %884 = vst [vmem:[#allocation2 + $0xc0] sm:$0xf] %v883_v26  ;;  %v7047_v55 = vcombine.low %v5927_v32, %v5928_v52  ;;  %v5929_v12 = vld [vmem:[#allocation2 + $0x48] sm:$0xf] }
 0x112   : > { %5118 = vmatmul.mubr.bf16.vlgmr.msra.gmra.mrb[0].mxu1 %v6984_v18  ;;  %v725_v44 = vsel %vm6320_vm10, %v717_v4, %v724_v31  ;;  %v887_v51 = vsel %vm6294_vm4, %v726_v39, %v886_v10  ;;  %5337 = vmatprep.mubr.bf16.mxu0 %v7024_v29  ;;  %v5930_v10 = vld [vmem:[#allocation2 + $0x4c] sm:$0xf] }
 0x113   : > { %5150 = vmatpush3.bf16.msra.mxu1 %v5922_v34  ;;  %5121 = vmatprep.mubr.bf16.mxu1 %v6986_v28  ;;  %885 = vst [vmem:[#allocation2 + $0xc4] sm:$0xf] %v725_v44  ;;  %888 = vst [vmem:[#allocation2 + $0xc8] sm:$0x1] %v887_v51  ;;  %v7054_v34 = vcombine.low %v5929_v12, %v5930_v10  ;;  %v5884_v44 = vld [vmem:[#allocation6 + $0xa8] sm:$0xff]  }
 0x114   : > { %5151 = vmatprep.subr.bf16.mxu1 %v5868_v40 }
 0x117   : > { %5152 = vmatpush3.bf16.msra.mxu1 %v5868_v40 }
 0x118   : > { %5153 = vmatprep.subr.bf16.mxu1 %v5872_v37  ;;  %v7042_v9 = vld [vmem:[#allocation2 + $0xc0] sm:$0xf] }
 0x119   : > { %v4599_v0 = vrot.slane %v7042_v9, 9  ;;  %v2659_v11 = vshrl.u32 %v7042_v9, 16  ;;  %v2662_v4 = vshll.u32 %v7042_v9, 16 }
 0x11a   : > { %5122 = vmatmul.mubr.bf16.gmra.mrb[4].mxu1 %v7036_v23  ;;  %v7044_v6 = vld [vmem:[#allocation2 + $0xc4] sm:$0xf]  ;;  %v939_v57 = vld [vmem:[#allocation2 + $0xc8] sm:$0x1] }
 0x11b   : > { %5125 = vmatprep.mubr.bf16.mxu1 %v7038_v27  ;;  %5154 = vmatpush3.bf16.msra.mxu1 %v5872_v37  ;;  %v2947_v40 = vrot.slane %v7044_v6, 5  ;;  %v2950_v33 = vrot.slane %v939_v57, 5  ;;  %v2668_v31 = vshll.u32 %v7044_v6, 16  ;;  %v2672_v39 = vshrl.u32 %v7044_v6, 16 }
 0x11c   : > { %5155 = vmatprep.subr.bf16.mxu1 %v5876_v54  ;;  %v2661_v51 = vrot.slane %v2659_v11, 4  ;;  %v2664_v5 = vrot.slane %v2662_v4, 5  ;;  %v2678_v10 = vshll.u32 %v939_v57, 16  ;;  %v5932_v4 = vld [vmem:[#allocation2 + $0x58] sm:$0xf] }
 0x11d   : > { %v2948_v26 = vsel %vm6578_vm14, %v4599_v0, %v2947_v40  ;;  %v2949_v37 = vrot.slane %v2947_v40, 4  ;;  %v2670_v48 = vrot.slane %v2668_v31, 5  ;;  %v2674_v60 = vrot.slane %v2672_v39, 4 }
 0x11e   : > { %v2665_v52 = vor.u32 %v2664_v5, %v2661_v51  ;;  %v2680_v11 = vrot.slane %v2678_v10, 5  ;;  %v5892_v5 = vld [vmem:[#allocation6 + $0xb8] sm:$0xff]  }
 0x11f   : > { %5156 = vmatpush3.bf16.msra.mxu1 %v5876_v54  ;;  %v2951_v21 = vsel %vm6578_vm14, %v2949_v37, %v2950_v33  ;;  %v2675_v12 = vor.u32 %v2674_v60, %v2670_v48  ;;  %v5888_v54 = vld [vmem:[#allocation6 + $0xb0] sm:$0xff]   ;;  %v5931_v33 = vld [vmem:[#allocation2 + $0x54] sm:$0xf]  ;;  %v5885_v60 = vld [vmem:[#allocation6 + $0x1c8] sm:$0xff]  }
 0x120   : > { %5157 = vmatprep.subr.bf16.mxu1 %v5880_v14  ;;  %v7061_v32 = vcombine.low %v2948_v26, %v2951_v21  ;;  %v2666_v0 = vrot.slane %v2665_v52, 4  ;;  %v7066_v31 = vcombine.low %v5931_v33, %v5932_v4  ;;  %v5934_v26 = vld [vmem:[#allocation2 + $0x64] sm:$0xf]  ;;  %v5935_v21 = vld [vmem:[#allocation2 + $0x6c] sm:$0xf]  ;;  %v5893_v10 = vld [vmem:[#allocation6 + $0x1d8] sm:$0xff]  }
 0x121   : > { %v2676_v40 = vrot.slane %v2675_v12, 4  ;;  %v5889_v12 = vld [vmem:[#allocation6 + $0x1d0] sm:$0xff]   ;;  %v4541_v4 = vrot.slane %v6951_v61, 9  ;;  %v5905_v61 = vld [vmem:[#allocation6 + $0x200] sm:$0xff]  }
 0x122   : > { %5126 = vmatmul.mubr.bf16.gmra.mrb[8].mxu1 %v7047_v55  ;;  %5338 = vmatmul.mubr.bf16.gmra.mrb[28].mxu0 %v7061_v32  ;;  %v2671_v39 = vsel %vm6314_vm9, %v2666_v0, %v2670_v48  ;;  %v5894_v48 = vld [vmem:[#allocation6 + $0xc0] sm:$0xff]   ;;  %v1962_v0 = vrot.slane %v6953_v20, 5 }
 0x123   : > { %5129 = vmatprep.mubr.bf16.mxu1 %v7054_v34  ;;  %5158 = vmatpush3.bf16.msra.mxu1 %v5880_v14  ;;  %v2681_v57 = vsel %vm6314_vm9, %v2676_v40, %v2680_v11  ;;  %v5933_v14 = vld [vmem:[#allocation2 + $0x60] sm:$0xf]  ;;  %v5899_v40 = vld [vmem:[#allocation6 + $0x1f0] sm:$0xff]  }
 0x124   : > { %5159 = vmatprep.subr.bf16.mxu1 %v5884_v44  ;;  %5357 = vmatprep.mubr.bf16.mxu0 %v6986_v28  ;;  %v7072_v37 = vcombine.low %v5933_v14, %v5934_v26  ;;  %v7074_v51 = vcombine.low %v2671_v39, %v2681_v57  ;;  %v5937_v11 = vld [vmem:[#allocation2 + $0x8] sm:$0x1]  ;;  %v1964_v39 = vrot.slane %v1962_v0, 4  ;;  %v5903_v57 = vld [vmem:[#allocation6 + $0x1f8] sm:$0xff]   ;;  %v1963_v20 = vsel %vm6578_vm14, %v4541_v4, %v1962_v0 }
 0x125   : > { %v1965_v33 = vrot.slane %v5937_v11, 5  ;;  %v5909_v0 = vld [vmem:[#allocation6 + $0x210] sm:$0xff]  }
 0x126   : > { %v5914_v11 = vld [vmem:[#allocation6 + $0x230] sm:$0xff]  }
 0x127   : > { %5160 = vmatpush3.bf16.msra.mxu1 %v5884_v44  ;;  %v5936_v44 = vld [vmem:[#allocation2 + $0x70] sm:$0xf]  ;;  %v1966_v14 = vsel %vm6578_vm14, %v1964_v39, %v1965_v33  ;;  %v7367_v33 = vld [vmem:[#allocation16_spill] sm:$0xff] }
 0x128   : > { %5161 = vmatprep.subr.bf16.mxu1 %v5888_v54  ;;  %v7081_v52 = vcombine.low %v5935_v21, %v5936_v44  ;;  %v4557_v26 = vcombine.low %v1963_v20, %v1966_v14  ;;  %v5901_v21 = vld [vmem:[#allocation6 + $0xd8] sm:$0xff]   ;;  %v7110_v44 = vcombine.low %v7042_v9, %v7044_v6  ;;  %v5906_v6 = vld [vmem:[#allocation6 + $0xe8] sm:$0xff]  }
 0x12a   : > { %5130 = vmatmul.mubr.bf16.gmra.mrb[12].mxu1 %v7066_v31  ;;  %5358 = vmatmul.mubr.bf16.vlgmr.msra.gmra.mrb[0].mxu0 %v7036_v23 }
 0x12b   : > { %5133 = vmatprep.mubr.bf16.mxu1 %v7072_v37  ;;  %5162 = vmatpush3.bf16.msra.mxu1 %v5888_v54  ;;  %v5897_v54 = vld [vmem:[#allocation6 + $0x1e8] sm:$0xff]  }
 0x12c   : > { %5163 = vmatprep.subr.bf16.mxu1 %v5892_v5  ;;  %5390 = vmatpush3.bf16.msra.mxu0 %v6817_v43  ;;  %v5895_v43 = vld [vmem:[#allocation6 + $0x1e0] sm:$0xff]  }
 0x12d   : > { %5361 = vmatprep.mubr.bf16.mxu0 %v7038_v27  ;;  %5391 = vmatprep.subr.bf16.mxu0 %v5885_v60 }
 0x12f   : > { %5164 = vmatpush3.bf16.msra.mxu1 %v5892_v5  ;;  %v5896_v5 = vld [vmem:[#allocation6 + $0xc8] sm:$0xff]  }
 0x130   : > { %5197 = vmatprep.subr.bf16.mxu1 %v5894_v48  ;;  %5392 = vmatpush3.bf16.msra.mxu0 %v5885_v60  ;;  %v5898_v60 = vld [vmem:[#allocation6 + $0xd0] sm:$0xff]  }
 0x131   : > { %5393 = vmatprep.subr.bf16.mxu0 %v5889_v12 }
 0x132   : > { %5134 = vmatmul.mubr.bf16.gmra.mrb[16].mxu1 %v7081_v52  ;;  %5362 = vmatmul.mubr.bf16.gmra.mrb[4].mxu0 %v7047_v55 }
 0x133   : > { %5137 = vmatprep.mubr.bf16.mxu1 %v6996_v49  ;;  %5365 = vmatprep.mubr.bf16.mxu0 %v7054_v34 }
 0x134   : > { %5394 = vmatpush3.bf16.msra.mxu0 %v5889_v12  ;;  %v7118_v12 = vld [vmem:[#allocation2 + $0xd0] sm:$0xf] }
 0x135   : > { %5395 = vmatprep.subr.bf16.mxu0 %v5893_v10  ;;  %v3492_v39 = vshrl.u32 %v7118_v12, 16  ;;  %v3488_v20 = vshll.u32 %v7118_v12, 16 }
 0x138   : > { %5396 = vmatpush3.bf16.msra.mxu0 %v5893_v10  ;;  %v5908_v10 = vld [vmem:[#allocation6 + $0xf0] sm:$0xff]  }
 0x139   : > { %5397 = vmatprep.subr.bf16.mxu0 %v5895_v43 }
 0x13a   : > { %5138 = vmatmul.mubr.bf16.gmra.mrb[20].mxu1 %v7002_v36  ;;  %5366 = vmatmul.mubr.bf16.gmra.mrb[8].mxu0 %v7066_v31 }
 0x13b   : > { %5141 = vmatprep.mubr.bf16.mxu1 %v7008_v2  ;;  %5369 = vmatprep.mubr.bf16.mxu0 %v7072_v37 }
 0x13c   : > { %5398 = vmatpush3.bf16.msra.mxu0 %v5895_v43  ;;  %v5910_v43 = vld [vmem:[#allocation6 + $0xf8] sm:$0xff]  }
 0x13d   : > { %5399 = vmatprep.subr.bf16.mxu0 %v5897_v54 }
 0x140   : > { %5400 = vmatpush3.bf16.msra.mxu0 %v5897_v54  ;;  %v5907_v54 = vld [vmem:[#allocation6 + $0x208] sm:$0xff]  }
 0x141   : > { %5401 = vmatprep.subr.bf16.mxu0 %v5899_v40 }
 0x142   : > { %5142 = vmatmul.mubr.bf16.gmra.mrb[24].mxu1 %v7012_v8  ;;  %5370 = vmatmul.mubr.bf16.gmra.mrb[12].mxu0 %v7081_v52 }
 0x143   : > { %5145 = vmatprep.mubr.bf16.mxu1 %v7016_v42  ;;  %5373 = vmatprep.mubr.bf16.mxu0 %v6996_v49 }
 0x144   : > { %5402 = vmatpush3.bf16.msra.mxu0 %v5899_v40  ;;  %v5938_v40 = vld [vmem:[#allocation6 + $0x100] sm:$0xff]  }
 0x145   : > { %5403 = vmatprep.subr.bf16.mxu0 %v5903_v57 }
 0x148   : > { %5404 = vmatpush3.bf16.msra.mxu0 %v5903_v57  ;;  %v7369_v57 = vld [vmem:[#allocation18_spill] sm:$0xff] }
 0x149   : > { %5437 = vmatprep.subr.bf16.mxu0 %v5905_v61 }
 0x14a   : > { %5146 = vmatmul.mubr.bf16.gmra.mrb[28].mxu1 %v7020_v50  ;;  %5374 = vmatmul.mubr.bf16.gmra.mrb[16].mxu0 %v7002_v36 }
 0x14b   : > { %5165 = vmatprep.mubr.bf16.mxu1 %v4557_v26  ;;  %5377 = vmatprep.mubr.bf16.mxu0 %v7008_v2  ;;  %v3490_v26 = vrot.slane %v3488_v20, 5 }
 0x152   : > { %5166 = vmatmul.mubr.bf16.vlgmr.msra.gmra.mrb[0].mxu1 %v6613_v30  ;;  %5378 = vmatmul.mubr.bf16.gmra.mrb[20].mxu0 %v7012_v8  ;;  %v5904_v30 = vld [vmem:[#allocation6 + $0xe0] sm:$0xff]  }
 0x153   : > { %5198 = vmatpush3.bf16.msra.mxu1 %v5894_v48  ;;  %5169 = vmatprep.mubr.bf16.mxu1 %v6654_v16  ;;  %v7116_v48 = vld [vmem:[#allocation2 + $0xcc] sm:$0xf] }
 0x154   : > { %5199 = vmatprep.subr.bf16.mxu1 %v5896_v5  ;;  %5381 = vmatprep.mubr.bf16.mxu0 %v7016_v42  ;;  %v4609_v9 = vcombine.low %v7116_v48, %v7118_v12  ;;  %v3482_v4 = vshll.u32 %v7116_v48, 16 }
 0x157   : > { %5200 = vmatpush3.bf16.msra.mxu1 %v5896_v5  ;;  %v3494_v5 = vrot.slane %v3492_v39, 4 }
 0x158   : > { %5201 = vmatprep.subr.bf16.mxu1 %v5898_v60 }
 0x15a   : > { %5170 = vmatmul.mubr.bf16.gmra.mrb[4].mxu1 %v6692_v22  ;;  %5382 = vmatmul.mubr.bf16.gmra.mrb[24].mxu0 %v7020_v50 }
 0x15b   : > { %5173 = vmatprep.mubr.bf16.mxu1 %v6733_v59  ;;  %5202 = vmatpush3.bf16.msra.mxu1 %v5898_v60  ;;  %v7150_v60 = vld [vmem:[#allocation2 + $0xd4] sm:$0x1] }
 0x15c   : > { %5203 = vmatprep.subr.bf16.mxu1 %v5901_v21  ;;  %5385 = vmatprep.mubr.bf16.mxu0 %v7110_v44 }
 0x15f   : > { %5204 = vmatpush3.bf16.msra.mxu1 %v5901_v21  ;;  %v7370_v21 = vld [vmem:[#allocation19_spill] sm:$0xff] }
 0x160   : > { %5205 = vmatprep.subr.bf16.mxu1 %v5904_v30 }
 0x162   : > { %5174 = vmatmul.mubr.bf16.gmra.mrb[8].mxu1 %v6776_v7  ;;  %5386 = vmatmul.mubr.bf16.gmra.mrb[28].mxu0 %v4609_v9 }
 0x163   : > { %5177 = vmatprep.mubr.bf16.mxu1 %v6815_v17  ;;  %5206 = vmatpush3.bf16.msra.mxu1 %v5904_v30  ;;  %v7371_v30 = vld [vmem:[#allocation20_spill] sm:$0xff] }
 0x164   : > { %5207 = vmatprep.subr.bf16.mxu1 %v5906_v6  ;;  %5405 = vmatprep.mubr.bf16.mxu0 %v6445_v35  ;;  %v5911_v35 = vld [vmem:[#allocation6 + $0x218] sm:$0xff]  }
 0x167   : > { %5208 = vmatpush3.bf16.msra.mxu1 %v5906_v6  ;;  %v3495_v6 = vor.u32 %v3494_v5, %v3490_v26 }
 0x168   : > { %5209 = vmatprep.subr.bf16.mxu1 %v5908_v10 }
 0x16a   : > { %5178 = vmatmul.mubr.bf16.gmra.mrb[12].mxu1 %v6856_v3  ;;  %5406 = vmatmul.mubr.bf16.vlgmr.msra.gmra.mrb[0].mxu0 %v6474_v15  ;;  %v5912_v15 = vld [vmem:[#allocation6 + $0x220] sm:$0xff]  }
 0x16b   : > { %5181 = vmatprep.mubr.bf16.mxu1 %v6895_v19  ;;  %5210 = vmatpush3.bf16.msra.mxu1 %v5908_v10  ;;  %v3498_v10 = vshll.u32 %v7150_v60, 16 }
 0x16c   : > { %5211 = vmatprep.subr.bf16.mxu1 %v5910_v43  ;;  %5438 = vmatpush3.bf16.msra.mxu0 %v5905_v61  ;;  %v3484_v61 = vrot.slane %v3482_v4, 5 }
 0x16d   : > { %5409 = vmatprep.mubr.bf16.mxu0 %v6499_v13  ;;  %5439 = vmatprep.subr.bf16.mxu0 %v5907_v54  ;;  %v5913_v13 = vld [vmem:[#allocation6 + $0x228] sm:$0xff]  }
 0x16f   : > { %5212 = vmatpush3.bf16.msra.mxu1 %v5910_v43  ;;  %v5940_v43 = vld [vmem:[#allocation6 + $0x110] sm:$0xff]  }
 0x170   : > { %5485 = vmatprep.subr.bf16.mxu1 %v5938_v40  ;;  %5440 = vmatpush3.bf16.msra.mxu0 %v5907_v54 }
 0x171   : > { %5441 = vmatprep.subr.bf16.mxu0 %v5909_v0 }
 0x172   : > { %5182 = vmatmul.mubr.bf16.gmra.mrb[16].mxu1 %v6903_v56  ;;  %5410 = vmatmul.mubr.bf16.gmra.mrb[4].mxu0 %v6555_v53  ;;  %v5915_v53 = vld [vmem:[#allocation6 + $0x238] sm:$0xff]  }
 0x173   : > { %5185 = vmatprep.mubr.bf16.mxu1 %v6934_v62  ;;  %5413 = vmatprep.mubr.bf16.mxu0 %v6599_v1  ;;  %v7366_v1 = vld [vmem:[#allocation15_spill] sm:$0xff] }
 0x174   : > { %5442 = vmatpush3.bf16.msra.mxu0 %v5909_v0  ;;  %v3500_v0 = vrot.slane %v3498_v10, 5 }
 0x175   : > { %5443 = vmatprep.subr.bf16.mxu0 %v5911_v35 }
 0x178   : > { %5444 = vmatpush3.bf16.msra.mxu0 %v5911_v35 }
 0x179   : > { %5445 = vmatprep.subr.bf16.mxu0 %v5912_v15 }
 0x17a   : > { %5186 = vmatmul.mubr.bf16.gmra.mrb[20].mxu1 %v6940_v41  ;;  %5414 = vmatmul.mubr.bf16.gmra.mrb[8].mxu0 %v6622_v46  ;;  %v7368_v46 = vld [vmem:[#allocation17_spill] sm:$0xff] }
 0x17b   : > { %5189 = vmatprep.mubr.bf16.mxu1 %v6964_v47  ;;  %5417 = vmatprep.mubr.bf16.mxu0 %v6665_v25  ;;  %v3479_v25 = vshrl.u32 %v7116_v48, 16 }
 0x17c   : > { %5446 = vmatpush3.bf16.msra.mxu0 %v5912_v15 }
 0x17d   : > { %5447 = vmatprep.subr.bf16.mxu0 %v5913_v13  ;;  %v3481_v14 = vrot.slane %v3479_v25, 4 }
 0x17f   : > { %v3485_v9 = vor.u32 %v3484_v61, %v3481_v14 }
 0x180   : > { %5448 = vmatpush3.bf16.msra.mxu0 %v5913_v13  ;;  %v5942_v13 = vld [vmem:[#allocation6 + $0x120] sm:$0xff]  }
 0x181   : > { %5449 = vmatprep.subr.bf16.mxu0 %v5914_v11  ;;  %v3486_v54 = vrot.slane %v3485_v9, 4 }
 0x182   : > { %5190 = vmatmul.mubr.bf16.gmra.mrb[24].mxu1 %v6973_v63  ;;  %5418 = vmatmul.mubr.bf16.gmra.mrb[12].mxu0 %v7366_v1 }
 0x183   : > { %5193 = vmatprep.mubr.bf16.mxu1 %v7022_v38  ;;  %5421 = vmatprep.mubr.bf16.mxu0 %v7367_v33 }
 0x184   : > { %5450 = vmatpush3.bf16.msra.mxu0 %v5914_v11 }
 0x185   : > { %5451 = vmatprep.subr.bf16.mxu0 %v5915_v53 }
 0x188   : > { %5452 = vmatpush3.bf16.msra.mxu0 %v5915_v53 }
 0x18a   : > { %5194 = vmatmul.mubr.bf16.gmra.mrb[28].mxu1 %v7024_v29  ;;  %5422 = vmatmul.mubr.bf16.gmra.mrb[16].mxu0 %v7368_v46 }
 0x18b   : > { %5213 = vmatprep.mubr.bf16.mxu1 %v6984_v18  ;;  %5425 = vmatprep.mubr.bf16.mxu0 %v7369_v57  ;;  %v5939_v18 = vld [vmem:[#allocation6 + $0x108] sm:$0xff]  }
 0x192   : > { %5214 = vmatmul.mubr.bf16.vlgmr.msra.gmra.mrb[0].mxu1 %v6986_v28  ;;  %5426 = vmatmul.mubr.bf16.gmra.mrb[20].mxu0 %v7370_v21  ;;  %v3496_v28 = vrot.slane %v3495_v6, 4 }
 0x193   : > { %5493 = vmatpush3.bf16.msra.mxu1 %v5938_v40  ;;  %5217 = vmatprep.mubr.bf16.mxu1 %v7036_v23  ;;  %v5941_v23 = vld [vmem:[#allocation6 + $0x118] sm:$0xff]   ;;  %v3491_v40 = vsel %vm6314_vm9, %v3486_v54, %v3490_v26 }
 0x194   : > { %5486 = vmatprep.subr.bf16.mxu1 %v5939_v18  ;;  %5429 = vmatprep.mubr.bf16.mxu0 %v7371_v30  ;;  %v3501_v35 = vsel %vm6314_vm9, %v3496_v28, %v3500_v0 }
 0x195   : > { %v4618_v15 = vcombine.low %v3491_v40, %v3501_v35 }
 0x197   : > { %5494 = vmatpush3.bf16.msra.mxu1 %v5939_v18 }
 0x198   : > { %5487 = vmatprep.subr.bf16.mxu1 %v5940_v43 }
 0x19a   : > { %5218 = vmatmul.mubr.bf16.gmra.mrb[4].mxu1 %v7038_v27  ;;  %5430 = vmatmul.mubr.bf16.gmra.mrb[24].mxu0 %v6967_v24  ;;  %v5943_v27 = vld [vmem:[#allocation6 + $0x128] sm:$0xff]  }
 0x19b   : > { %5221 = vmatprep.mubr.bf16.mxu1 %v7047_v55  ;;  %5495 = vmatpush3.bf16.msra.mxu1 %v5940_v43  ;;  %v5944_v55 = vld [vmem:[#allocation6 + $0x130] sm:$0xff]  }
 0x19c   : > { %5488 = vmatprep.subr.bf16.mxu1 %v5941_v23  ;;  %5433 = vmatprep.mubr.bf16.mxu0 %v7074_v51 }
 0x19f   : > { %5496 = vmatpush3.bf16.msra.mxu1 %v5941_v23 }
 0x1a0   : > { %5489 = vmatprep.subr.bf16.mxu1 %v5942_v13 }
 0x1a2   : > { %5222 = vmatmul.mubr.bf16.gmra.mrb[8].mxu1 %v7054_v34  ;;  %5434 = vmatmul.mubr.bf16.gmra.mrb[28].mxu0 %v4618_v15 }
 0x1a3   : > { %5225 = vmatprep.mubr.bf16.mxu1 %v7066_v31  ;;  %5497 = vmatpush3.bf16.msra.mxu1 %v5942_v13 }
 0x1a4   : > { %5490 = vmatprep.subr.bf16.mxu1 %v5943_v27  ;;  %5453 = vmatprep.mubr.bf16.mxu0 %v6654_v16  ;;  %v3767_v16 = vrot.slane %v7118_v12, 5 }
 0x1a7   : > { %5498 = vmatpush3.bf16.msra.mxu1 %v5943_v27 }
 0x1a8   : > { %5491 = vmatprep.subr.bf16.mxu1 %v5944_v55 }
 0x1aa   : > { %5226 = vmatmul.mubr.bf16.gmra.mrb[12].mxu1 %v7072_v37  ;;  %5454 = vmatmul.mubr.bf16.vlgmr.msra.gmra.mrb[0].mxu0 %v6692_v22  ;;  %v4627_v22 = vrot.slane %v7116_v48, 9 }
 0x1ab   : > { %5229 = vmatprep.mubr.bf16.mxu1 %v7081_v52  ;;  %5499 = vmatpush3.bf16.msra.mxu1 %v5944_v55 }
 0x1ac   : > { %5492 = vmatprep.subr.bf16.mxu1 %v5945_v45  ;;  %5457 = vmatprep.mubr.bf16.mxu0 %v6733_v59  ;;  %v3769_v59 = vrot.slane %v3767_v16, 4 }
 0x1af   : > { %5500 = vmatpush3.bf16.msra.mxu1 %v5945_v45 }
 0x1b2   : > { %5230 = vmatmul.mubr.bf16.gmra.mrb[16].mxu1 %v6996_v49  ;;  %5458 = vmatmul.mubr.bf16.gmra.mrb[4].mxu0 %v6776_v7  ;;  %v3770_v7 = vrot.slane %v7150_v60, 5 }
 0x1b3   : > { %5233 = vmatprep.mubr.bf16.mxu1 %v7002_v36  ;;  %5461 = vmatprep.mubr.bf16.mxu0 %v6815_v17  ;;  %v3768_v17 = vsel %vm6578_vm14, %v4627_v22, %v3767_v16 }
 0x1ba   : > { %5234 = vmatmul.mubr.bf16.gmra.mrb[20].mxu1 %v7008_v2  ;;  %5462 = vmatmul.mubr.bf16.gmra.mrb[8].mxu0 %v6856_v3 }
 0x1bb   : > { %5237 = vmatprep.mubr.bf16.mxu1 %v7012_v8  ;;  %5465 = vmatprep.mubr.bf16.mxu0 %v6895_v19 }
 0x1c2   : > { %5238 = vmatmul.mubr.bf16.gmra.mrb[24].mxu1 %v7016_v42  ;;  %5466 = vmatmul.mubr.bf16.gmra.mrb[12].mxu0 %v6903_v56 }
 0x1c3   : > { %5241 = vmatprep.mubr.bf16.mxu1 %v7020_v50  ;;  %5469 = vmatprep.mubr.bf16.mxu0 %v6934_v62 }
 0x1ca   : > { %5242 = vmatmul.mubr.bf16.gmra.mrb[28].mxu1 %v7110_v44  ;;  %5470 = vmatmul.mubr.bf16.gmra.mrb[16].mxu0 %v6940_v41 }
 0x1cb   : > { %5277 = vmatprep.mubr.bf16.mxu1 %v7366_v1  ;;  %5473 = vmatprep.mubr.bf16.mxu0 %v6964_v47 }
 0x1d2   : > { %5278 = vmatmul.mubr.bf16.vlgmr.msra.gmra.mrb[16].mxu1 %v7367_v33  ;;  %5474 = vmatmul.mubr.bf16.gmra.mrb[20].mxu0 %v6973_v63  ;;  %v3771_v63 = vsel %vm6578_vm14, %v3769_v59, %v3770_v7 }
 0x1d3   : > { %5281 = vmatprep.mubr.bf16.mxu1 %v7368_v46  ;;  %5477 = vmatprep.mubr.bf16.mxu0 %v7022_v38  ;;  %v4628_v3 = vcombine.low %v3768_v17, %v3771_v63 }
 0x1da   : > { %5282 = vmatmul.mubr.bf16.gmra.mrb[20].mxu1 %v7369_v57  ;;  %5478 = vmatmul.mubr.bf16.gmra.mrb[24].mxu0 %v7024_v29 }
 0x1db   : > { %5285 = vmatprep.mubr.bf16.mxu1 %v7370_v21  ;;  %5481 = vmatprep.mubr.bf16.mxu0 %v7061_v32 }
 0x1e2   : > { %5286 = vmatmul.mubr.bf16.gmra.mrb[24].mxu1 %v7371_v30  ;;  %5482 = vmatmul.mubr.bf16.gmra.mrb[28].mxu0 %v4628_v3 }
 0x1e3   : > { %5289 = vmatprep.mubr.bf16.mxu1 %v6967_v24 }
 0x1ea   : > { %5290 = vmatmul.mubr.bf16.gmra.mrb[28].mxu1 %v7074_v51 }
 0x265   : > { %v5215_v19 = vpop.f32.mrb[0].mxu1 }
 0x266   : > { %v2499_v56 = vpop.f32.mrb[1].mxu1 }
 0x267   : > { %v5216_v41 = vpop.f32.mrb[2].mxu1 }
 0x268   : > { %v2502_v62 = vpop.f32.mrb[3].mxu1 }
 0x26d   : > { %v5219_v47 = vpop.f32.mrb[4].mxu1 }
 0x26e   : > { %v2515_v49 = vpop.f32.mrb[5].mxu1 }
 0x26f   : > { %v5220_v36 = vpop.f32.mrb[6].mxu1 }
 0x270   : > { %v2518_v2 = vpop.f32.mrb[7].mxu1 }
 0x275   : > { %v5223_v8 = vpop.f32.mrb[8].mxu1 }
 0x276   : > { %v2531_v58 = vpop.f32.mrb[9].mxu1 }
 0x277   : > { %v5224_v42 = vpop.f32.mrb[10].mxu1 }
 0x278   : > { %v2534_v50 = vpop.f32.mrb[11].mxu1 }
 0x27d   : > { %v7205_v38 = vpop.f32.mrb[12].mxu1  ;;  %v5455_v34 = vpop.f32.mrb[0].mxu0 }
 0x27e   : > { %v7207_v29 = vpop.f32.mrb[13].mxu1  ;;  %v5501_v31 = vadd.f32 %v5455_v34, %v5215_v19  ;;  %v3875_v37 = vpop.f32.mrb[1].mxu0 }
 0x27f   : > { %v7209_v24 = vpop.f32.mrb[14].mxu1  ;;  %v5502_v51 = vadd.f32 %v3875_v37, %v2499_v56  ;;  %v5456_v52 = vpop.f32.mrb[2].mxu0 }
 0x280   : > { %v7211_v32 = vpop.f32.mrb[15].mxu1  ;;  %v5503_v44 = vadd.f32 %v5456_v52, %v5216_v41  ;;  %v3878_v48 = vpop.f32.mrb[3].mxu0  ;;  %v4234_v25 = vmul.f32 %v5501_v31, %v5501_v31 }
 0x281   : > { %v5504_v12 = vadd.f32 %v3878_v48, %v2502_v62  ;;  %v4232_v53 = vmul.f32 %v5502_v51, %v5502_v51 }
 0x282   : > { %v4750_v11 = vpack.c.bf16 %v5503_v44, %v5501_v31  ;;  %v4235_v61 = vmul.f32 %v5503_v44, %v5503_v44 }
 0x283   : > { %v4745_v1 = vpack.c.bf16 %v5504_v12, %v5502_v51  ;;  %v4194_v33 = vadd.f32 %v5504_v12, %v5502_v51  ;;  %v4233_v46 = vmul.f32 %v5504_v12, %v5504_v12 }
 0x284   : > { %4822 = vst [vmem:[%s7214_s20 + $0x8] sm:$0xff] %v4750_v11  }
 0x285   : > { %4746 = vst [vmem:[%s7214_s20] sm:$0xff] %v4745_v1   ;;  %v4195_v4 = vadd.f32 %v5501_v31, %v4194_v33  ;;  %v4264_v39 = vadd.f32 %v4233_v46, %v4232_v53  ;;  %v5459_v57 = vpop.f32.mrb[4].mxu0 }
 0x286   : > { %v5505_v20 = vadd.f32 %v5459_v57, %v5219_v47  ;;  %v3891_v14 = vpop.f32.mrb[5].mxu0 }
 0x287   : > { %v4265_v26 = vadd.f32 %v4264_v39, %v4234_v25  ;;  %v5506_v5 = vadd.f32 %v3891_v14, %v2515_v49  ;;  %v4196_v60 = vadd.f32 %v5503_v44, %v4195_v4  ;;  %v5460_v18 = vpop.f32.mrb[6].mxu0 }
 0x288   : > { %v5507_v21 = vadd.f32 %v5460_v18, %v5220_v36  ;;  %v3894_v30 = vpop.f32.mrb[7].mxu0  ;;  %v4238_v35 = vmul.f32 %v5505_v20, %v5505_v20 }
 0x289   : > { %v4197_v9 = vadd.f32 %v5506_v5, %v4196_v60  ;;  %v4236_v6 = vmul.f32 %v5506_v5, %v5506_v5  ;;  %v4266_v10 = vadd.f32 %v4265_v26, %v4235_v61  ;;  %v5508_v43 = vadd.f32 %v3894_v30, %v2518_v2 }
 0x28a   : > { %v4760_v54 = vpack.c.bf16 %v5507_v21, %v5505_v20  ;;  %v4239_v16 = vmul.f32 %v5507_v21, %v5507_v21 }
 0x28b   : > { %v4267_v28 = vadd.f32 %v4266_v10, %v4236_v6  ;;  %v4755_v0 = vpack.c.bf16 %v5508_v43, %v5506_v5  ;;  %v4198_v23 = vadd.f32 %v5508_v43, %v4197_v9  ;;  %v4237_v40 = vmul.f32 %v5508_v43, %v5508_v43 }
 0x28c   : > { %4824 = vst [vmem:[%s7214_s20 + $0x18] sm:$0xff] %v4760_v54  }
 0x28d   : > { %4823 = vst [vmem:[%s7214_s20 + $0x10] sm:$0xff] %v4755_v0   ;;  %v4199_v15 = vadd.f32 %v5505_v20, %v4198_v23  ;;  %v4268_v13 = vadd.f32 %v4267_v28, %v4237_v40  ;;  %v5463_v27 = vpop.f32.mrb[8].mxu0 }
 0x28e   : > { %v5509_v55 = vadd.f32 %v5463_v27, %v5223_v8  ;;  %v3907_v45 = vpop.f32.mrb[9].mxu0 }
 0x28f   : > { %v4269_v22 = vadd.f32 %v4268_v13, %v4238_v35  ;;  %v5510_v59 = vadd.f32 %v3907_v45, %v2531_v58  ;;  %v4200_v7 = vadd.f32 %v5507_v21, %v4199_v15  ;;  %v5464_v17 = vpop.f32.mrb[10].mxu0 }
 0x290   : > { %v5511_v63 = vadd.f32 %v5464_v17, %v5224_v42  ;;  %v3910_v3 = vpop.f32.mrb[11].mxu0  ;;  %v4242_v8 = vmul.f32 %v5509_v55, %v5509_v55 }
 0x291   : > { %v4201_v19 = vadd.f32 %v5510_v59, %v4200_v7  ;;  %v4240_v56 = vmul.f32 %v5510_v59, %v5510_v59  ;;  %v4270_v41 = vadd.f32 %v4269_v22, %v4239_v16  ;;  %v5512_v62 = vadd.f32 %v3910_v3, %v2534_v50 }
 0x292   : > { %v4770_v47 = vpack.c.bf16 %v5511_v63, %v5509_v55  ;;  %v4243_v42 = vmul.f32 %v5511_v63, %v5511_v63 }
 0x293   : > { %v4271_v49 = vadd.f32 %v4270_v41, %v4240_v56  ;;  %v4765_v36 = vpack.c.bf16 %v5512_v62, %v5510_v59  ;;  %v4202_v2 = vadd.f32 %v5512_v62, %v4201_v19  ;;  %v4241_v34 = vmul.f32 %v5512_v62, %v5512_v62 }
 0x294   : > { %4826 = vst [vmem:[%s7214_s20 + $0x28] sm:$0xff] %v4770_v47  }
 0x295   : > { %4825 = vst [vmem:[%s7214_s20 + $0x20] sm:$0xff] %v4765_v36   ;;  %v4203_v31 = vadd.f32 %v5509_v55, %v4202_v2  ;;  %v4272_v37 = vadd.f32 %v4271_v49, %v4241_v34  ;;  %v5467_v58 = vpop.f32.mrb[12].mxu0 }
 0x296   : > { %v5513_v51 = vadd.f32 %v5467_v58, %v7205_v38  ;;  %v3923_v52 = vpop.f32.mrb[13].mxu0 }
 0x297   : > { %v4273_v44 = vadd.f32 %v4272_v37, %v4242_v8  ;;  %v5514_v48 = vadd.f32 %v3923_v52, %v7207_v29  ;;  %v4204_v50 = vadd.f32 %v5511_v63, %v4203_v31  ;;  %v5468_v12 = vpop.f32.mrb[14].mxu0 }
 0x298   : > { %v5515_v11 = vadd.f32 %v5468_v12, %v7209_v24  ;;  %v3926_v53 = vpop.f32.mrb[15].mxu0  ;;  %v4246_v14 = vmul.f32 %v5513_v51, %v5513_v51 }
 0x299   : > { %v4205_v1 = vadd.f32 %v5514_v48, %v4204_v50  ;;  %v4244_v33 = vmul.f32 %v5514_v48, %v5514_v48  ;;  %v4274_v46 = vadd.f32 %v4273_v44, %v4243_v42  ;;  %v5516_v25 = vadd.f32 %v3926_v53, %v7211_v32 }
 0x29a   : > { %v4780_v4 = vpack.c.bf16 %v5515_v11, %v5513_v51  ;;  %v4247_v60 = vmul.f32 %v5515_v11, %v5515_v11 }
 0x29b   : > { %v4275_v39 = vadd.f32 %v4274_v46, %v4244_v33  ;;  %v4775_v38 = vpack.c.bf16 %v5516_v25, %v5514_v48  ;;  %v4206_v57 = vadd.f32 %v5516_v25, %v4205_v1  ;;  %v4245_v20 = vmul.f32 %v5516_v25, %v5516_v25 }
 0x29c   : > { %4828 = vst [vmem:[%s7214_s20 + $0x38] sm:$0xff] %v4780_v4  }
 0x29d   : > { %4827 = vst [vmem:[%s7214_s20 + $0x30] sm:$0xff] %v4775_v38   ;;  %v4207_v29 = vadd.f32 %v5513_v51, %v4206_v57  ;;  %v4276_v61 = vadd.f32 %v4275_v39, %v4245_v20  ;;  %v5471_v26 = vpop.f32.mrb[16].mxu0 }
 0x29e   : > { %v3939_v5 = vpop.f32.mrb[17].mxu0 }
 0x29f   : > { %v4277_v24 = vadd.f32 %v4276_v61, %v4246_v14  ;;  %v4208_v18 = vadd.f32 %v5515_v11, %v4207_v29  ;;  %v5472_v21 = vpop.f32.mrb[18].mxu0 }
 0x2a0   : > { %v3942_v30 = vpop.f32.mrb[19].mxu0 }
 0x2a1   : > { %v4278_v9 = vadd.f32 %v4277_v24, %v4247_v60 }
 0x2a5   : > { %v5279_v6 = vpop.f32.mrb[16].mxu1  ;;  %v5475_v28 = vpop.f32.mrb[20].mxu0 }
 0x2a6   : > { %v5517_v32 = vadd.f32 %v5471_v26, %v5279_v6  ;;  %v2849_v10 = vpop.f32.mrb[17].mxu1  ;;  %v3955_v40 = vpop.f32.mrb[21].mxu0 }
 0x2a7   : > { %v5518_v43 = vadd.f32 %v3939_v5, %v2849_v10  ;;  %v5280_v54 = vpop.f32.mrb[18].mxu1  ;;  %v5476_v27 = vpop.f32.mrb[22].mxu0 }
 0x2a8   : > { %v5519_v0 = vadd.f32 %v5472_v21, %v5280_v54  ;;  %v2852_v23 = vpop.f32.mrb[19].mxu1  ;;  %v3958_v45 = vpop.f32.mrb[23].mxu0  ;;  %v4250_v17 = vmul.f32 %v5517_v32, %v5517_v32 }
 0x2a9   : > { %v4209_v35 = vadd.f32 %v5518_v43, %v4208_v18  ;;  %v4248_v15 = vmul.f32 %v5518_v43, %v5518_v43  ;;  %v5520_v13 = vadd.f32 %v3942_v30, %v2852_v23 }
 0x2aa   : > { %v4790_v55 = vpack.c.bf16 %v5519_v0, %v5517_v32  ;;  %v4251_v62 = vmul.f32 %v5519_v0, %v5519_v0 }
 0x2ab   : > { %v4279_v16 = vadd.f32 %v4278_v9, %v4248_v15  ;;  %v4785_v22 = vpack.c.bf16 %v5520_v13, %v5518_v43  ;;  %v4210_v59 = vadd.f32 %v5520_v13, %v4209_v35  ;;  %v4249_v7 = vmul.f32 %v5520_v13, %v5520_v13 }
 0x2ac   : > { %4830 = vst [vmem:[%s7214_s20 + $0x48] sm:$0xff] %v4790_v55  }
 0x2ad   : > { %4829 = vst [vmem:[%s7214_s20 + $0x40] sm:$0xff] %v4785_v22   ;;  %v4211_v63 = vadd.f32 %v5517_v32, %v4210_v59  ;;  %v4280_v3 = vadd.f32 %v4279_v16, %v4249_v7  ;;  %v5283_v19 = vpop.f32.mrb[20].mxu1  ;;  %v5479_v34 = vpop.f32.mrb[24].mxu0 }
 0x2ae   : > { %v5521_v56 = vadd.f32 %v5475_v28, %v5283_v19  ;;  %v2865_v41 = vpop.f32.mrb[21].mxu1  ;;  %v3971_v37 = vpop.f32.mrb[25].mxu0 }
 0x2af   : > { %v4281_v47 = vadd.f32 %v4280_v3, %v4250_v17  ;;  %v5522_v49 = vadd.f32 %v3955_v40, %v2865_v41  ;;  %v4212_v36 = vadd.f32 %v5519_v0, %v4211_v63  ;;  %v5284_v2 = vpop.f32.mrb[22].mxu1  ;;  %v5480_v44 = vpop.f32.mrb[26].mxu0 }
 0x2b0   : > { %v5523_v8 = vadd.f32 %v5476_v27, %v5284_v2  ;;  %v2868_v31 = vpop.f32.mrb[23].mxu1  ;;  %v3974_v50 = vpop.f32.mrb[27].mxu0  ;;  %v4254_v33 = vmul.f32 %v5521_v56, %v5521_v56 }
 0x2b1   : > { %v4213_v58 = vadd.f32 %v5522_v49, %v4212_v36  ;;  %v4252_v51 = vmul.f32 %v5522_v49, %v5522_v49  ;;  %v4282_v52 = vadd.f32 %v4281_v47, %v4251_v62  ;;  %v5524_v42 = vadd.f32 %v3958_v45, %v2868_v31 }
 0x2b2   : > { %v4800_v48 = vpack.c.bf16 %v5523_v8, %v5521_v56  ;;  %v4255_v57 = vmul.f32 %v5523_v8, %v5523_v8 }
 0x2b3   : > { %v4283_v12 = vadd.f32 %v4282_v52, %v4252_v51  ;;  %v4795_v11 = vpack.c.bf16 %v5524_v42, %v5522_v49  ;;  %v4214_v53 = vadd.f32 %v5524_v42, %v4213_v58  ;;  %v4253_v1 = vmul.f32 %v5524_v42, %v5524_v42 }
 0x2b4   : > { %4832 = vst [vmem:[%s7214_s20 + $0x58] sm:$0xff] %v4800_v48  }
 0x2b5   : > { %4831 = vst [vmem:[%s7214_s20 + $0x50] sm:$0xff] %v4795_v11   ;;  %v4215_v46 = vadd.f32 %v5521_v56, %v4214_v53  ;;  %v4284_v25 = vadd.f32 %v4283_v12, %v4253_v1  ;;  %v5287_v4 = vpop.f32.mrb[24].mxu1  ;;  %v5483_v26 = vpop.f32.mrb[28].mxu0 }
 0x2b6   : > { %v5525_v39 = vadd.f32 %v5479_v34, %v5287_v4  ;;  %v2881_v38 = vpop.f32.mrb[25].mxu1  ;;  %v3987_v24 = vpop.f32.mrb[29].mxu0 }
 0x2b7   : > { %v4285_v20 = vadd.f32 %v4284_v25, %v4254_v33  ;;  %v5526_v14 = vadd.f32 %v3971_v37, %v2881_v38  ;;  %v4216_v29 = vadd.f32 %v5523_v8, %v4215_v46  ;;  %v5288_v61 = vpop.f32.mrb[26].mxu1  ;;  %v5484_v6 = vpop.f32.mrb[30].mxu0 }
 0x2b8   : > { %v5527_v5 = vadd.f32 %v5480_v44, %v5288_v61  ;;  %v2884_v60 = vpop.f32.mrb[27].mxu1  ;;  %v3990_v10 = vpop.f32.mrb[31].mxu0  ;;  %v4258_v23 = vmul.f32 %v5525_v39, %v5525_v39 }
 0x2b9   : > { %v4217_v18 = vadd.f32 %v5526_v14, %v4216_v29  ;;  %v4256_v21 = vmul.f32 %v5526_v14, %v5526_v14  ;;  %v4286_v30 = vadd.f32 %v4285_v20, %v4255_v57  ;;  %v5528_v9 = vadd.f32 %v3974_v50, %v2884_v60 }
 0x2ba   : > { %v4810_v32 = vpack.c.bf16 %v5527_v5, %v5525_v39  ;;  %v4259_v55 = vmul.f32 %v5527_v5, %v5527_v5 }
 0x2bb   : > { %v4287_v43 = vadd.f32 %v4286_v30, %v4256_v21  ;;  %v4805_v54 = vpack.c.bf16 %v5528_v9, %v5526_v14  ;;  %v4218_v28 = vadd.f32 %v5528_v9, %v4217_v18  ;;  %v4257_v0 = vmul.f32 %v5528_v9, %v5528_v9 }
 0x2bc   : > { %4834 = vst [vmem:[%s7214_s20 + $0x68] sm:$0xff] %v4810_v32  }
 0x2bd   : > { %4833 = vst [vmem:[%s7214_s20 + $0x60] sm:$0xff] %v4805_v54   ;;  %v4219_v40 = vadd.f32 %v5525_v39, %v4218_v28  ;;  %v4288_v35 = vadd.f32 %v4287_v43, %v4257_v0  ;;  %v5291_v15 = vpop.f32.mrb[28].mxu1 }
 0x2be   : > { %v5529_v13 = vadd.f32 %v5483_v26, %v5291_v15  ;;  %v2897_v27 = vpop.f32.mrb[29].mxu1 }
 0x2bf   : > { %v4289_v45 = vadd.f32 %v4288_v35, %v4258_v23  ;;  %v5530_v16 = vadd.f32 %v3987_v24, %v2897_v27  ;;  %v4220_v22 = vadd.f32 %v5527_v5, %v4219_v40  ;;  %v5292_v59 = vpop.f32.mrb[30].mxu1 }
 0x2c0   : > { %v5531_v7 = vadd.f32 %v5484_v6, %v5292_v59  ;;  %v2900_v17 = vpop.f32.mrb[31].mxu1  ;;  %v4262_v2 = vmul.f32 %v5529_v13, %v5529_v13 }
 0x2c1   : > { %v4221_v63 = vadd.f32 %v5530_v16, %v4220_v22  ;;  %v4260_v3 = vmul.f32 %v5530_v16, %v5530_v16  ;;  %v4290_v19 = vadd.f32 %v4289_v45, %v4259_v55  ;;  %v5532_v56 = vadd.f32 %v3990_v10, %v2900_v17 }
 0x2c2   : > { %v4820_v41 = vpack.c.bf16 %v5531_v7, %v5529_v13 }
 0x2c3   : > { %v4291_v62 = vadd.f32 %v4290_v19, %v4260_v3  ;;  %v4815_v47 = vpack.c.bf16 %v5532_v56, %v5530_v16  ;;  %v4222_v49 = vadd.f32 %v5532_v56, %v4221_v63  ;;  %v4261_v36 = vmul.f32 %v5532_v56, %v5532_v56 }
 0x2c4   : > { %4836 = vst [vmem:[%s7214_s20 + $0x78] sm:$0xff] %v4820_v41  }
 0x2c5   : > { %4835 = vst [vmem:[%s7214_s20 + $0x70] sm:$0xff] %v4815_v47   ;;  %v4223_v34 = vadd.f32 %v5529_v13, %v4222_v49  ;;  %v4292_v8 = vadd.f32 %v4291_v62, %v4261_v36 }
 0x2c6   : > { %6017 = shalt.err (!%p6014_p7)
}
 0x2c7   : > { %s6018_s30 = scalar_lea.hbm %s7239_s10, 2048  ;;  %s6022_s8 = scalar_lea.hbm %s7320_s2, 4096 }
 0x2c8   : > { %p6019_p9 = scmp.ne.s32.totalorder %s7239_s10, %s6018_s30  ;;  %p6023_p5 = scmp.lt.u32.totalorder %s7239_s10, %s7320_s2 }
 0x2c9   : > { %p6024_p11 = scmp.lt.u32.totalorder %s6022_s8, %s6018_s30  ;;  %p6026_p4 = scmp.lt.u32.totalorder %s6018_s30, %s7239_s10 }
 0x2ca   : > { %p6020_p2 = pnand %p6019_p9, %p6230_p12 }
 0x2cb   : > { %p6025_p1 = por %p6024_p11, %p6023_p5 }
 0x2cc   : > { %p6021_p0 = pneg %p6020_p2 }
 0x2cd   : > { %p6027_p6 = por %p6026_p4, %p6025_p1 }
 0x2cf   : > { %p6028_p8 = pnand %p6027_p6, %p6021_p0 }
 0x2d1   : > { %6031 = shalt.err (!%p6028_p8)
}
 0x2d2   : > { %s6116_s20 = smov 64   ;;  %s6117_s4 = smov 4   ;;  %v4263_v31 = vmul.f32 %v5531_v7, %v5531_v7  ;;  %v4224_v37 = vadd.f32 %v5531_v7, %v4223_v34  ;;  %v4293_v58 = vadd.f32 %v4292_v8, %v4262_v2 }
 0x2d3   : > { %5763 = dma.vmem_to_hbm [thread:$0]  (%p6230_p12), %s7241_s25, 2048, %s7239_s10, %s4303_s11, %s6116_s20, %s6116_s20, %s6117_s4  }
 0x2d4   : > { %v4225_v51 = vrot.slane %v4224_v37, 4  ;;  %v4294_v52 = vadd.f32 %v4293_v58, %v4263_v31  ;;  %s4460_s26 = sshll.u32 %s6278_s6, 1  ;;  %s4673_s5 = sshll.u32 %s6160_s16, 5 }
 0x2d5   : > { %s214_s27 = scalar_lea.vmem [#allocation9], %s4460_s26  ;;  %s7274_s11 = scalar_lea.hbm %s7321_s3, %s4673_s5 }
 0x2d6   : > { %v4226_v42 = vadd.f32 %v4225_v51, %v4224_v37  ;;  %v4295_v44 = vrot.slane %v4294_v52, 4  ;;  %s4337_s28 = sshll.u32 %s214_s27, 4  ;;  %s4308_s29 = scalar_lea.sflag [#allocation10], %s6278_s6  ;;  %s7276_s28 = int_to_ptr.vmem [resolvable:$true] %s4337_s28 }
 0x2d7   : > { %s6032_s23 = scalar_lea.vmem %s7276_s28, 32  ;;  %s6118_s16 = smov [#allocation9]  }
 0x2d8   : > { %v4227_v48 = vrot.slane %v4226_v42, 2  ;;  %v4296_v50 = vadd.f32 %v4295_v44, %v4294_v52  ;;  %p6033_p10 = scmp.ne.s32.totalorder %s7276_s28, %s6032_s23  ;;  %s6036_s30 = sshll.u32 %s6118_s16, 4  ;;  %s6037_s30 = int_to_ptr.vmem [resolvable:$false] %s6036_s30 }
 0x2d9   : > { %s6038_s22 = scalar_lea.vmem %s6037_s30, 64  ;;  %p6039_p7 = scmp.lt.s32.totalorder %s7276_s28, %s6037_s30 }
 0x2da   : > { %v4228_v12 = vadd.f32 %v4227_v48, %v4226_v42  ;;  %v4297_v11 = vrot.slane %v4296_v50, 2  ;;  %p6034_p13 = pnand %p6033_p10, %p6230_p12  ;;  %p6040_p9 = scmp.lt.s32.totalorder %s6038_s22, %s6032_s23 }
 0x2dc   : > { %v4229_v53 = vrot.slane %v4228_v12, 1  ;;  %v4298_v1 = vadd.f32 %v4297_v11, %v4296_v50  ;;  %p6035_p3 = pneg %p6034_p13  ;;  %p6041_p2 = por %p6040_p9, %p6039_p7 }
 0x2de   : > { %v4230_v33 = vadd.f32 %v4229_v53, %v4228_v12  ;;  %v4299_v46 = vrot.slane %v4298_v1, 1  ;;  %p6042_p0 = pnand %p6041_p2, %p6035_p3 }
 0x2e0   : > { %4231 = vst [vmem:[%s214_s27] sm:$0x1] %v4230_v33  ;;  %v4300_v25 = vadd.f32 %v4299_v46, %v4298_v1 }
 0x2e2   : > { %4301 = vst [vmem:[%s214_s27 + $0x1] sm:$0x1] %v4300_v25 }
 0x2e3   : > { %6045 = shalt.err (!%p6042_p0)
}
 0x2e4   : > { %s6046_s6 = scalar_lea.hbm %s7274_s11, 32  ;;  %s6050_s9 = scalar_lea.hbm %s7321_s3, 64 }
 0x2e5   : > { %p6047_p5 = scmp.ne.s32.totalorder %s7274_s11, %s6046_s6  ;;  %p6051_p4 = scmp.lt.u32.totalorder %s7274_s11, %s7321_s3 }
 0x2e6   : > { %p6052_p6 = scmp.lt.u32.totalorder %s6050_s9, %s6046_s6  ;;  %p6054_p10 = scmp.lt.u32.totalorder %s6046_s6, %s7274_s11 }
 0x2e7   : > { %p6048_p11 = pnand %p6047_p5, %p6230_p12 }
 0x2e8   : > { %p6053_p8 = por %p6052_p6, %p6051_p4 }
 0x2e9   : > { %p6049_p1 = pneg %p6048_p11 }
 0x2ea   : > { %p6055_p13 = por %p6054_p10, %p6053_p8 }
 0x2ec   : > { %p6056_p3 = pnand %p6055_p13, %p6049_p1 }
 0x2ee   : > { %6059 = shalt.err (!%p6056_p3)
}
 0x2ef   : > { %5764 = dma.vmem_to_hbm [thread:$0]  (%p6230_p12), %s7276_s28, 32, %s7274_s11, %s4308_s29  }
 0x2f0 PF: > { %s4349_s4 = sand.u32 1, %s6094_s12   ;;  %p7372_p7 = scmp.ne.s32.totalorder %s7338_s19, 0 }
 0x2f1   : > { %p7373_p9 = scmp.ge.s32.totalorder %s6106_s15, 2  ;;  %s4350_s26 = scalar_lea.sflag [#allocation5], %s4349_s4 }
 0x2f3   : > { %p5776_p2 = pnand %p7373_p9, %p7372_p7 }
 0x2f5   : > { %6085 = dma.done.wait (!%p5776_p2), %s4350_s26, 2048  }
 0x2f6   : > { %6087 = vsyncadd (!%p5776_p2), %s4350_s26, 4294965248  ;;  %s4359_s5 = scalar_lea.sflag [#allocation10], %s4349_s4 }
 0x2f7   : > { %6089 = dma.done.wait (!%p5776_p2), %s4359_s5, 32  }
 0x2f8   : > { %6091 = vsyncadd (!%p5776_p2), %s4359_s5, 4294967264  ;;  %p21_p12 = scmp.ge.s32.totalorder %s6195_s24, 4   ;;  %s7374_s12 = smov %s6098_s13 }
 0x2f9   : > { %s7375_s13 = smov %s6102_s14  ;;  %s7376_s14 = smov %s6226_s17 }
 0x2fa   : > { %s7377_s15 = smov %s6195_s24  ;;  %23 = sbr.rel (!%p21_p12) target bundleno = 8 (0x8), region = 104 }
 0x301   :  { %4364 = vsyncpa [#allocation4], 1 }
 0x302   :  { %4366 = vsyncpa [#allocation4 + $0x1], 1 }
 0x303   :  { %4367 = vsyncpa [#allocation7], 1 }
 0x304   :  { %4368 = vsyncpa [#allocation5], 1 }
 0x305   :  { %4370 = vsyncpa [#allocation5 + $0x1], 1 }
 0x306   :  { %4371 = vsyncpa [#allocation10], 1 }
 0x307   :  { %4373 = vsyncpa [#allocation10 + $0x1], 1 }

</bundles_post_ra>
